<compile_context>
chip_gen: v6e
topology: v6e:2x2x1
jax: 0.10.0
libtpu: 0.0.40
codegen_flags: <defaults>
</compile_context>

<pallas_src>
import functools

import numpy as np

import jax
import jax.numpy as jnp
from jax import lax
from jax.experimental import pallas as pl
from jax.experimental.pallas import tpu as pltpu


# ---------------------------------------------------------------------------
# helpers
# ---------------------------------------------------------------------------
def _round_up(x, m):
    return ((x + m - 1) // m) * m


def _pad_to(x, size, axis):
    pad = size - x.shape[axis]
    if pad <= 0:
        return x
    widths = [(0, 0)] * x.ndim
    widths[axis] = (0, pad)
    return jnp.pad(x, widths)


def _mm_nt(a, b):
    """(M, C) x (N, C) -> (M, N), contracting C, f32 accumulation."""
    return lax.dot_general(a, b, (((1,), (1,)), ((), ())),
                           preferred_element_type=jnp.float32)


# ---------------------------------------------------------------------------
# strided-roll availability probe (one-time).  The optimized rel-shift uses
# pltpu.roll with a per-row stride; if that fails to lower (or has unexpected
# semantics) we fall back to a roll-free slice/select rel-shift.
# ---------------------------------------------------------------------------
_ROLL_OK = None


def _probe_kernel(x_ref, o_ref, *, qlen):
    x = x_ref[...]
    kp = x.shape[1]
    y = pltpu.roll(x, 0, 1, stride=1, stride_axis=0)   # row i: right-roll by i
    base = (kp - qlen + 1) % kp
    if base:
        y = pltpu.roll(y, base, 1)                     # uniform right-roll
    o_ref[...] = y


def _strided_roll_available():
    global _ROLL_OK
    if _ROLL_OK is None:
        try:
            qlen, kp = 8, 128
            x = jnp.arange(qlen * kp, dtype=jnp.float32).reshape(qlen, kp)
            got = pl.pallas_call(
                functools.partial(_probe_kernel, qlen=qlen),
                out_shape=jax.ShapeDtypeStruct((qlen, kp), jnp.float32),
            )(x)
            got = np.asarray(jax.device_get(got))
            xn = np.asarray(jax.device_get(x))
            want = np.stack(
                [np.roll(xn[i], i - qlen + 1) for i in range(qlen)], axis=0)
            _ROLL_OK = bool(np.array_equal(got, want))
        except Exception:
            _ROLL_OK = False
    return _ROLL_OK


# ---------------------------------------------------------------------------
# kernel
# ---------------------------------------------------------------------------
def _decoder_kernel(z_ref, cat_ref, uq_ref, ukv_ref, rk_ref, maskb_ref, hmask_ref,
                    wq_ref, wkv_ref, rwb_ref, rrb_ref, wo_ref, bo_ref,
                    wff1_ref, bff1_ref, wff2_ref, bff2_ref,
                    out_ref, *,
                    n_head, d_head, qlen, qlen_p, rel_shift_mode):
    f32 = jnp.float32
    bf16 = jnp.bfloat16
    H = n_head * d_head
    kp = cat_ref.shape[1]
    scale = 1.0 / (d_head ** 0.5)

    z = z_ref[0]                                  # (qlen_p, d_model) f32   residual branch
    x = cat_ref[0]                                # (kp, d_model)    bf16  [mems ; z ; 0pad]

    # qkv_net (kernel-size-1 Conv1d == channel matmul), bf16 x bf16 -> f32 acc.
    # Q is only needed on the query rows; K/V over the full window.
    q = jnp.dot(z.astype(bf16), wq_ref[...],
                preferred_element_type=f32) + uq_ref[0]          # (qlen_p, H)
    kv = jnp.dot(x, wkv_ref[...],
                 preferred_element_type=f32) + ukv_ref[0]        # (kp, 2H)
    k = kv[:, :H]
    v = kv[:, H:]

    # softmax scale folded into the (small) query side; biases pre-scaled in wrapper.
    q = q * scale
    rw_q = q + rwb_ref[...]                       # (qlen_p, H) + (1, H)
    rr_q = q + rrb_ref[...]

    # --- head batching via block-masked queries ------------------------------
    # Row (h, i) keeps only head h's channels; a single (n_head*qlen_p, H) x
    # (kp, H)^T matmul then equals the per-head scores stacked over rows (one
    # full-width MXU op, no per-head push/pop, no concatenate of head outputs).
    hm = hmask_ref[...]                           # (n_head, H) one-hot head blocks
    q_rw_blk = jnp.concatenate(
        [rw_q * hm[h:h + 1, :] for h in range(n_head)], axis=0)  # (n_head*qlen_p, H)
    q_rr_blk = jnp.concatenate(
        [rr_q * hm[h:h + 1, :] for h in range(n_head)], axis=0)

    ac = _mm_nt(q_rw_blk.astype(bf16), k.astype(bf16))           # (n_head*qlen_p, kp)
    bd = jnp.dot(q_rr_blk.astype(bf16), rk_ref[...],
                 preferred_element_type=f32)                     # (n_head*qlen_p, kp)

    # --- Transformer-XL rel-shift --------------------------------------------
    # row (h, i) needs out[.., j] = bd[.., (j + qlen - 1 - i) mod kp]; only entries
    # that survive the causal/local mask are trusted, so the modulo-kp wrap of the
    # padded lanes is harmless.
    if rel_shift_mode == "roll":
        shifted = []
        for h in range(n_head):                    # n_head cheap XLU ops, no matmuls
            bd_h = bd[h * qlen_p:(h + 1) * qlen_p, :]
            shifted.append(pltpu.roll(bd_h, 0, 1, stride=1, stride_axis=0))
        bd = jnp.concatenate(shifted, axis=0)
        base = (kp - qlen + 1) % kp
        if base:
            bd = pltpu.roll(bd, base, 1)
    else:
        # direction-unambiguous fallback: qlen_p full-tile left rotations built
        # with explicit slicing, combined by row-select.
        rows = lax.broadcasted_iota(jnp.int32, (n_head * qlen_p, kp), 0) % qlen_p
        acc = jnp.zeros_like(bd)
        for i in range(qlen_p):
            c = (qlen - 1 - i) % kp                # left-roll amount for query row i
            rolled = bd if c == 0 else jnp.concatenate(
                [bd[:, c:], bd[:, :c]], axis=1)
            acc = jnp.where(rows == i, rolled, acc)
        bd = acc

    # --- masked softmax (f32, finite -1e30 fill, EUP reciprocal) -------------
    scores = ac + bd + maskb_ref[...]              # (n_head*qlen_p, kp)
    m = jnp.max(scores, axis=-1, keepdims=True)
    e = jnp.exp(scores - m)
    l = jnp.sum(e, axis=-1, keepdims=True)
    p = e * pl.reciprocal(l, approx=True)

    # --- P @ V, then pick head h's channel block from head h's rows ----------
    av = jnp.dot(p.astype(bf16), v.astype(bf16),
                 preferred_element_type=f32)       # (n_head*qlen_p, H)
    attn_vec = av[0:qlen_p, :] * hm[0:1, :]
    for h in range(1, n_head):
        attn_vec = attn_vec + av[h * qlen_p:(h + 1) * qlen_p, :] * hm[h:h + 1, :]

    # o_net (Conv1d k=1 with bias) + residual + post-LayerNorm over d_model
    attn_out = jnp.dot(attn_vec.astype(bf16), wo_ref[...],
                       preferred_element_type=f32) + bo_ref[...]
    out = attn_out + z
    mu = jnp.mean(out, axis=-1, keepdims=True)
    var = jnp.mean((out - mu) ** 2, axis=-1, keepdims=True)
    out = (out - mu) * lax.rsqrt(var + 1e-5)

    # position-wise FFN + residual + post-LayerNorm over d_model
    h1 = jnp.dot(out.astype(bf16), wff1_ref[...],
                 preferred_element_type=f32) + bff1_ref[...]
    h1 = jnp.maximum(h1, 0.0)
    h2 = jnp.dot(h1.astype(bf16), wff2_ref[...],
                 preferred_element_type=f32) + bff2_ref[...]
    y = h2 + out
    mu2 = jnp.mean(y, axis=-1, keepdims=True)
    var2 = jnp.mean((y - mu2) ** 2, axis=-1, keepdims=True)
    y = (y - mu2) * lax.rsqrt(var2 + 1e-5)

    out_ref[0] = y.astype(out_ref.dtype)


# ---------------------------------------------------------------------------
# wrappers
# ---------------------------------------------------------------------------
def transformer_decoder_forward_nlc(z_now, z_hist, u, pos_emb, params, *,
                                    n_head, d_head, local_size=None,
                                    out_dtype=None):
    """Seq-major entry point (no layout transposes).

    z_now:  (bsz, qlen, d_model)   z_hist: (bsz, mlen, d_model)
    u:      (bsz, klen, 3H)        pos_emb: (rlen, d_model), rlen == klen
    returns (bsz, qlen, d_model)
    """
    f32, bf16 = jnp.float32, jnp.bfloat16
    bsz, qlen, d_model = z_now.shape
    mlen = z_hist.shape[1]
    klen = mlen + qlen
    rlen = pos_emb.shape[0]
    assert rlen == klen, "Transformer-XL rel-shift requires rlen == klen"
    H = n_head * d_head
    d_inner = params['W_ff1'].shape[0]
    ls = local_size or 1000
    out_dtype = out_dtype or z_now.dtype
    scale = 1.0 / (d_head ** 0.5)

    qlen_p = _round_up(qlen, 8)                      # f32 sublane alignment
    kp = _round_up(mlen + qlen_p, 128)               # lane-dense key/pos axis

    # activations (padded, seq-major)
    cat = _pad_to(jnp.concatenate([z_hist, z_now], axis=1), kp, 1).astype(bf16)
    z_p = _pad_to(z_now, qlen_p, 1).astype(f32)

    # input injection split: q channels on the query rows, k/v channels on all rows
    u_q = _pad_to(u[:, mlen:, :H], qlen_p, 1).astype(f32)          # (bsz, qlen_p, H)
    u_kv = _pad_to(u[:, :, H:], kp, 1).astype(f32)                 # (bsz, kp, 2H)

    # r_net is batch independent -> hoisted out of the kernel; pre-transposed so
    # the BD matmul in the kernel is a plain (M,K)x(K,N) MXU op.
    r_k = _pad_to(jnp.dot(pos_emb, params['W_r'].T), kp, 0)        # (kp, H)
    r_k_t = jnp.transpose(r_k).astype(bf16)                        # (H, kp)

    # causal + local + padding mask, precomputed once (additive, finite fill)
    qi = jnp.arange(qlen_p)[:, None]
    kj = jnp.arange(kp)[None, :]
    masked = ((kj > qi + mlen) | (kj <= qi + mlen - ls)
              | (kj >= klen) | (qi >= qlen))
    mask_bias = jnp.where(masked, -1e30, 0.0).astype(f32)
    mask_bias = jnp.tile(mask_bias, (n_head, 1))     # (n_head*qlen_p, kp)

    head_mask = (jnp.arange(H)[None, :] // d_head
                 == jnp.arange(n_head)[:, None]).astype(f32)       # (n_head, H)

    W_qkv = params['W_qkv']                          # (3H, d_model)
    W_q = W_qkv[:H].T.astype(bf16)                   # (d_model, H)
    W_kv = W_qkv[H:].T.astype(bf16)                  # (d_model, 2H)

    args = (
        z_p, cat, u_q, u_kv, r_k_t, mask_bias, head_mask,
        W_q, W_kv,
        (params['r_w_bias'].reshape(1, H) * scale).astype(f32),    # pre-scaled
        (params['r_r_bias'].reshape(1, H) * scale).astype(f32),
        params['W_o'].T.astype(bf16),                # (H, d_model)
        params['b_o'].reshape(1, d_model).astype(f32),
        params['W_ff1'].T.astype(bf16),              # (d_model, d_inner)
        params['b_ff1'].reshape(1, d_inner).astype(f32),
        params['W_ff2'].T.astype(bf16),              # (d_inner, d_model)
        params['b_ff2'].reshape(1, d_model).astype(f32),
    )

    def batched(a):
        return pl.BlockSpec((1,) + a.shape[1:], lambda b: (b, 0, 0))

    def shared(a):
        return pl.BlockSpec(a.shape, lambda b: (0, 0))

    in_specs = [batched(a) for a in args[:4]] + [shared(a) for a in args[4:]]
    out_specs = pl.BlockSpec((1, qlen_p, d_model), lambda b: (b, 0, 0))

    kern = functools.partial(
        _decoder_kernel, n_head=n_head, d_head=d_head, qlen=qlen,
        qlen_p=qlen_p,
        rel_shift_mode="roll" if _strided_roll_available() else "select")

    out = pl.pallas_call(
        kern,
        out_shape=jax.ShapeDtypeStruct((bsz, qlen_p, d_model), out_dtype),
        grid_spec=pltpu.PrefetchScalarGridSpec(
            num_scalar_prefetch=0,
            grid=(bsz,),
            in_specs=in_specs,
            out_specs=out_specs,
        ),
        compiler_params=pltpu.CompilerParams(
            dimension_semantics=("parallel",),
            vmem_limit_bytes=32 * 1024 * 1024,
        ),
    )(*args)
    return out[:, :qlen, :]


def transformer_decoder_forward(z_now, z_hist, u, pos_emb, params, *,
                                n_head, d_head, local_size=None, out_dtype=None):
    """Drop-in NCL (batch, channel, seq) wrapper matching the PyTorch module.

    TODO(synk): in a DEQ stack, call transformer_decoder_forward_nlc directly and
    keep activations seq-major to avoid the HBM transposes around every layer.
    """
    out = transformer_decoder_forward_nlc(
        jnp.transpose(z_now, (0, 2, 1)),
        jnp.transpose(z_hist, (0, 2, 1)),
        jnp.transpose(u, (0, 2, 1)),
        jnp.transpose(pos_emb[0], (1, 0)),
        params, n_head=n_head, d_head=d_head,
        local_size=local_size, out_dtype=out_dtype)
    return jnp.transpose(out, (0, 2, 1))


# ---------------------------------------------------------------------------
# pure-JAX reference (transcription of the PyTorch forward, for verification)
# ---------------------------------------------------------------------------
def reference_forward(z_now, z_hist, u, pos_emb, params, *,
                      n_head, d_head, local_size=None):
    bsz, d_model, qlen = z_now.shape
    mlen = z_hist.shape[-1]
    cat = jnp.concatenate([z_hist, z_now], axis=-1)
    klen = cat.shape[-1]
    rlen = pos_emb.shape[-1]
    H = n_head * d_head
    scale = 1.0 / (d_head ** 0.5)
    ls = local_size if local_size is not None else 1000

    w_heads = jnp.einsum('oc,bcl->bol', params['W_qkv'], cat) + u
    r_head_k = jnp.einsum('oc,cl->ol', params['W_r'], pos_emb[0])

    w_q, w_k, w_v = jnp.split(w_heads, 3, axis=1)
    w_q = w_q[:, :, -qlen:].reshape(bsz, n_head, d_head, qlen)
    w_k = w_k.reshape(bsz, n_head, d_head, klen)
    w_v = w_v.reshape(bsz, n_head, d_head, klen)
    r_k = r_head_k.reshape(n_head, d_head, rlen)

    rw_q = w_q + params['r_w_bias'][None, :, :, None]
    rr_q = w_q + params['r_r_bias'][None, :, :, None]
    AC = jnp.einsum('bndi,bndj->bnij', rw_q, w_k)
    BD = jnp.einsum('bndi,ndj->bnij', rr_q, r_k)

    xp = jnp.pad(BD, ((0, 0), (0, 0), (0, 0), (1, 0)))
    xp = xp.reshape(bsz, n_head, rlen + 1, qlen)
    BD = xp[:, :, 1:, :].reshape(bsz, n_head, qlen, rlen)

    score = (AC + BD) * scale
    i = jnp.arange(qlen)[:, None]
    j = jnp.arange(klen)[None, :]
    mask = (j > i + mlen) | (j <= i + mlen - ls)
    score = jnp.where(mask[None, None], -jnp.inf, score)
    prob = jax.nn.softmax(score, axis=-1)

    attn_vec = jnp.einsum('bnij,bndj->bndi', prob, w_v).reshape(bsz, H, qlen)
    attn_out = jnp.einsum('oc,bcl->bol', params['W_o'], attn_vec) \
        + params['b_o'][None, :, None]
    out = attn_out + z_now

    def ln(x, axis):
        mu = jnp.mean(x, axis=axis, keepdims=True)
        var = jnp.mean((x - mu) ** 2, axis=axis, keepdims=True)
        return (x - mu) / jnp.sqrt(var + 1e-5)

    out = ln(out, axis=1)

    inp = jnp.transpose(out, (0, 2, 1))
    h1 = jax.nn.relu(inp @ params['W_ff1'].T + params['b_ff1'])
    h2 = h1 @ params['W_ff2'].T + params['b_ff2']
    y = ln(h2 + inp, axis=-1)
    return jnp.transpose(y, (0, 2, 1))


if __name__ == "__main__":
    bsz, n_head, d_head, d_model, d_inner = 2, 2, 16, 32, 64
    qlen, mlen = 8, 8
    H = n_head * d_head
    klen = qlen + mlen

    key = jax.random.PRNGKey(0)
    ks = jax.random.split(key, 16)

    def unif(k, shape):
        return jax.random.uniform(k, shape, jnp.float32, -0.05, 0.05)

    params = dict(
        W_qkv=unif(ks[0], (3 * H, d_model)),
        W_r=unif(ks[1], (H, d_model)),
        r_w_bias=unif(ks[2], (n_head, d_head)),
        r_r_bias=unif(ks[3], (n_head, d_head)),
        W_o=unif(ks[4], (d_model, H)),
        b_o=unif(ks[5], (d_model,)),
        W_ff1=unif(ks[6], (d_inner, d_model)),
        b_ff1=unif(ks[7], (d_inner,)),
        W_ff2=unif(ks[8], (d_model, d_inner)),
        b_ff2=unif(ks[9], (d_model,)),
    )
    z_now = jax.random.normal(ks[10], (bsz, d_model, qlen), jnp.float32)
    z_hist = jax.random.normal(ks[11], (bsz, d_model, mlen), jnp.float32)
    u_inj = 0.1 * jax.random.normal(ks[12], (bsz, 3 * H, klen), jnp.float32)
    pos_emb = jax.random.normal(ks[13], (1, d_model, klen), jnp.float32)

    out = transformer_decoder_forward(z_now, z_hist, u_inj, pos_emb, params,
                                      n_head=n_head, d_head=d_head)
    out = jax.block_until_ready(out)

    ref = reference_forward(z_now, z_hist, u_inj, pos_emb, params,
                            n_head=n_head, d_head=d_head)
    assert out.shape == (bsz, d_model, qlen), out.shape
    err = float(jnp.max(jnp.abs(out - ref)))
    assert jnp.allclose(out, ref, atol=2e-2, rtol=2e-2), f"max abs err {err}"
    print("KERNEL_OK")
</pallas_src>

<mosaic_0001>
module attributes {stable_mosaic.version = 11 : i64} {
  func.func @_probe_kernel(%arg0: memref<8x128xf32, #tpu.memory_space<vmem>>, %arg1: memref<8x128xf32, #tpu.memory_space<vmem>>) attributes {dimension_semantics = [], scalar_prefetch = 0 : i64, scratch_operands = 0 : i64, tpu.core_type = #tpu.core_type<tc>} {
    %c0 = arith.constant 0 : index
    %c0_0 = arith.constant 0 : index
    %0 = vector.load %arg0[%c0, %c0_0] : memref<8x128xf32, #tpu.memory_space<vmem>>, vector<8x128xf32>
    %c0_i32 = arith.constant 0 : i32
    %1 = tpu.dynamic_rotate %0 by %c0_i32 dim 1 {stride = 1 : si32, stride_dimension = 0 : si32} : vector<8x128xf32>, i32 -> vector<8x128xf32>
    %c121_i32 = arith.constant 121 : i32
    %2 = tpu.dynamic_rotate %1 by %c121_i32 dim 1 : vector<8x128xf32>, i32 -> vector<8x128xf32>
    %c0_1 = arith.constant 0 : index
    %c0_2 = arith.constant 0 : index
    %3 = vector.load %arg1[%c0_1, %c0_2] : memref<8x128xf32, #tpu.memory_space<vmem>>, vector<8x128xf32>
    tpu.vector_store %arg1[%c0_1, %c0_2], %2 {strides = array<i32>} : memref<8x128xf32, #tpu.memory_space<vmem>>, vector<8x128xf32>,
    return
  }
}

module attributes {stable_mosaic.version = 11 : i64} {
  func.func @_decoder_kernel(%arg0: i32, %arg1: memref<1x8x32xf32, #tpu.memory_space<vmem>>, %arg2: memref<1x128x32xbf16, #tpu.memory_space<vmem>>, %arg3: memref<1x8x32xf32, #tpu.memory_space<vmem>>, %arg4: memref<1x128x64xf32, #tpu.memory_space<vmem>>, %arg5: memref<32x128xbf16, #tpu.memory_space<vmem>>, %arg6: memref<16x128xf32, #tpu.memory_space<vmem>>, %arg7: memref<2x32xf32, #tpu.memory_space<vmem>>, %arg8: memref<32x32xbf16, #tpu.memory_space<vmem>>, %arg9: memref<32x64xbf16, #tpu.memory_space<vmem>>, %arg10: memref<1x32xf32, #tpu.memory_space<vmem>>, %arg11: memref<1x32xf32, #tpu.memory_space<vmem>>, %arg12: memref<32x32xbf16, #tpu.memory_space<vmem>>, %arg13: memref<1x32xf32, #tpu.memory_space<vmem>>, %arg14: memref<32x64xbf16, #tpu.memory_space<vmem>>, %arg15: memref<1x64xf32, #tpu.memory_space<vmem>>, %arg16: memref<64x32xbf16, #tpu.memory_space<vmem>>, %arg17: memref<1x32xf32, #tpu.memory_space<vmem>>, %arg18: memref<1x8x32xf32, #tpu.memory_space<vmem>>) attributes {dimension_semantics = [#tpu.dimension_semantics<parallel>], iteration_bounds = array<i64: 2>, scalar_prefetch = 0 : i64, scratch_operands = 0 : i64, tpu.core_type = #tpu.core_type<tc>, window_params = [{transform_indices = @transform_0, window_bounds = array<i64: 1, 8, 32>}, {transform_indices = @transform_1, window_bounds = array<i64: 1, 128, 32>}, {transform_indices = @transform_2, window_bounds = array<i64: 1, 8, 32>}, {transform_indices = @transform_3, window_bounds = array<i64: 1, 128, 64>}, {pipeline_mode = #tpu.pipeline_mode<synchronous>, transform_indices = @transform_4, window_bounds = array<i64: 32, 128>}, {pipeline_mode = #tpu.pipeline_mode<synchronous>, transform_indices = @transform_5, window_bounds = array<i64: 16, 128>}, {pipeline_mode = #tpu.pipeline_mode<synchronous>, transform_indices = @transform_6, window_bounds = array<i64: 2, 32>}, {pipeline_mode = #tpu.pipeline_mode<synchronous>, transform_indices = @transform_7, window_bounds = array<i64: 32, 32>}, {pipeline_mode = #tpu.pipeline_mode<synchronous>, transform_indices = @transform_8, window_bounds = array<i64: 32, 64>}, {pipeline_mode = #tpu.pipeline_mode<synchronous>, transform_indices = @transform_9, window_bounds = array<i64: 1, 32>}, {pipeline_mode = #tpu.pipeline_mode<synchronous>, transform_indices = @transform_10, window_bounds = array<i64: 1, 32>}, {pipeline_mode = #tpu.pipeline_mode<synchronous>, transform_indices = @transform_11, window_bounds = array<i64: 32, 32>}, {pipeline_mode = #tpu.pipeline_mode<synchronous>, transform_indices = @transform_12, window_bounds = array<i64: 1, 32>}, {pipeline_mode = #tpu.pipeline_mode<synchronous>, transform_indices = @transform_13, window_bounds = array<i64: 32, 64>}, {pipeline_mode = #tpu.pipeline_mode<synchronous>, transform_indices = @transform_14, window_bounds = array<i64: 1, 64>}, {pipeline_mode = #tpu.pipeline_mode<synchronous>, transform_indices = @transform_15, window_bounds = array<i64: 64, 32>}, {pipeline_mode = #tpu.pipeline_mode<synchronous>, transform_indices = @transform_16, window_bounds = array<i64: 1, 32>}, {transform_indices = @transform_17, window_bounds = array<i64: 1, 8, 32>}]} {
    %c0 = arith.constant 0 : index
    %c0_0 = arith.constant 0 : index
    %c0_1 = arith.constant 0 : index
    %0 = vector.load %arg1[%c0, %c0_0, %c0_1] : memref<1x8x32xf32, #tpu.memory_space<vmem>>, vector<1x8x32xf32>
    %1 = vector.shape_cast %0 : vector<1x8x32xf32> to vector<8x32xf32>
    %c0_2 = arith.constant 0 : index
    %c0_3 = arith.constant 0 : index
    %c0_4 = arith.constant 0 : index
    %2 = vector.load %arg2[%c0_2, %c0_3, %c0_4] : memref<1x128x32xbf16, #tpu.memory_space<vmem>>, vector<1x128x32xbf16>
    %3 = vector.shape_cast %2 : vector<1x128x32xbf16> to vector<128x32xbf16>
    %4 = arith.truncf %1 : vector<8x32xf32> to vector<8x32xbf16>
    %c0_5 = arith.constant 0 : index
    %c0_6 = arith.constant 0 : index
    %5 = vector.load %arg8[%c0_5, %c0_6] : memref<32x32xbf16, #tpu.memory_space<vmem>>, vector<32x32xbf16>
    %cst = arith.constant dense<0.000000e+00> : vector<8x32xf32>
    %6 = tpu.matmul %4, %5, %cst {dimension_numbers = #tpu.dot_dimension_numbers<[1], [0], [0], [1], [0, 0, 1, 1], [], []>} : vector<8x32xbf16>, vector<32x32xbf16>, vector<8x32xf32> -> vector<8x32xf32>
    %c0_7 = arith.constant 0 : index
    %c0_8 = arith.constant 0 : index
    %c0_9 = arith.constant 0 : index
    %7 = vector.load %arg3[%c0_7, %c0_8, %c0_9] : memref<1x8x32xf32, #tpu.memory_space<vmem>>, vector<1x8x32xf32>
    %8 = vector.shape_cast %7 : vector<1x8x32xf32> to vector<8x32xf32>
    %9 = arith.addf %6, %8 : vector<8x32xf32>
    %c0_10 = arith.constant 0 : index
    %c0_11 = arith.constant 0 : index
    %10 = vector.load %arg9[%c0_10, %c0_11] : memref<32x64xbf16, #tpu.memory_space<vmem>>, vector<32x64xbf16>
    %cst_12 = arith.constant dense<0.000000e+00> : vector<128x64xf32>
    %11 = tpu.matmul %3, %10, %cst_12 {dimension_numbers = #tpu.dot_dimension_numbers<[1], [0], [0], [1], [0, 0, 1, 1], [], []>} : vector<128x32xbf16>, vector<32x64xbf16>, vector<128x64xf32> -> vector<128x64xf32>
    %c0_13 = arith.constant 0 : index
    %c0_14 = arith.constant 0 : index
    %c0_15 = arith.constant 0 : index
    %12 = vector.load %arg4[%c0_13, %c0_14, %c0_15] : memref<1x128x64xf32, #tpu.memory_space<vmem>>, vector<1x128x64xf32>
    %13 = vector.shape_cast %12 : vector<1x128x64xf32> to vector<128x64xf32>
    %14 = arith.addf %11, %13 : vector<128x64xf32>
    %15 = vector.extract_strided_slice %14 {offsets = [0, 0], sizes = [128, 32], strides = [1, 1]} : vector<128x64xf32> to vector<128x32xf32>
    %16 = vector.extract_strided_slice %14 {offsets = [0, 32], sizes = [128, 32], strides = [1, 1]} : vector<128x64xf32> to vector<128x32xf32>
    %cst_16 = arith.constant 2.500000e-01 : f32
    %17 = vector.broadcast %cst_16 : f32 to vector<8x32xf32>
    %18 = arith.mulf %9, %17 : vector<8x32xf32>
    %c0_17 = arith.constant 0 : index
    %c0_18 = arith.constant 0 : index
    %19 = vector.load %arg10[%c0_17, %c0_18] : memref<1x32xf32, #tpu.memory_space<vmem>>, vector<1x32xf32>
    %20 = vector.broadcast %19 : vector<1x32xf32> to vector<8x32xf32>
    %21 = arith.addf %18, %20 : vector<8x32xf32>
    %c0_19 = arith.constant 0 : index
    %c0_20 = arith.constant 0 : index
    %22 = vector.load %arg11[%c0_19, %c0_20] : memref<1x32xf32, #tpu.memory_space<vmem>>, vector<1x32xf32>
    %23 = vector.broadcast %22 : vector<1x32xf32> to vector<8x32xf32>
    %24 = arith.addf %18, %23 : vector<8x32xf32>
    %c0_21 = arith.constant 0 : index
    %c0_22 = arith.constant 0 : index
    %25 = vector.load %arg7[%c0_21, %c0_22] : memref<2x32xf32, #tpu.memory_space<vmem>>, vector<2x32xf32>
    %26 = vector.extract_strided_slice %25 {offsets = [0, 0], sizes = [1, 32], strides = [1, 1]} : vector<2x32xf32> to vector<1x32xf32>
    %27 = vector.broadcast %26 : vector<1x32xf32> to vector<8x32xf32>
    %28 = arith.mulf %21, %27 : vector<8x32xf32>
    %29 = vector.extract_strided_slice %25 {offsets = [1, 0], sizes = [1, 32], strides = [1, 1]} : vector<2x32xf32> to vector<1x32xf32>
    %30 = vector.broadcast %29 : vector<1x32xf32> to vector<8x32xf32>
    %31 = arith.mulf %21, %30 : vector<8x32xf32>
    %32 = tpu.concatenate %28, %31 in 0 : vector<8x32xf32>, vector<8x32xf32> -> vector<16x32xf32>
    %33 = vector.extract_strided_slice %25 {offsets = [0, 0], sizes = [1, 32], strides = [1, 1]} : vector<2x32xf32> to vector<1x32xf32>
    %34 = vector.broadcast %33 : vector<1x32xf32> to vector<8x32xf32>
    %35 = arith.mulf %24, %34 : vector<8x32xf32>
    %36 = vector.extract_strided_slice %25 {offsets = [1, 0], sizes = [1, 32], strides = [1, 1]} : vector<2x32xf32> to vector<1x32xf32>
    %37 = vector.broadcast %36 : vector<1x32xf32> to vector<8x32xf32>
    %38 = arith.mulf %24, %37 : vector<8x32xf32>
    %39 = tpu.concatenate %35, %38 in 0 : vector<8x32xf32>, vector<8x32xf32> -> vector<16x32xf32>
    %40 = arith.truncf %32 : vector<16x32xf32> to vector<16x32xbf16>
    %41 = arith.truncf %15 : vector<128x32xf32> to vector<128x32xbf16>
    %cst_23 = arith.constant dense<0.000000e+00> : vector<16x128xf32>
    %42 = tpu.matmul %40, %41, %cst_23 {dimension_numbers = #tpu.dot_dimension_numbers<[1], [1], [0], [0], [0, 0, 1, 0], [], []>} : vector<16x32xbf16>, vector<128x32xbf16>, vector<16x128xf32> -> vector<16x128xf32>
    %43 = arith.truncf %39 : vector<16x32xf32> to vector<16x32xbf16>
    %c0_24 = arith.constant 0 : index
    %c0_25 = arith.constant 0 : index
    %44 = vector.load %arg5[%c0_24, %c0_25] : memref<32x128xbf16, #tpu.memory_space<vmem>>, vector<32x128xbf16>
    %cst_26 = arith.constant dense<0.000000e+00> : vector<16x128xf32>
    %45 = tpu.matmul %43, %44, %cst_26 {dimension_numbers = #tpu.dot_dimension_numbers<[1], [0], [0], [1], [0, 0, 1, 1], [], []>} : vector<16x32xbf16>, vector<32x128xbf16>, vector<16x128xf32> -> vector<16x128xf32>
    %46 = tpu.iota {dimensions = array<i32: 0>} : vector<16x128xi32>
    %c8_i32 = arith.constant 8 : i32
    %c0_i32 = arith.constant 0 : i32
    %47 = arith.cmpi eq, %c8_i32, %c0_i32 : i32
    %c1_i32 = arith.constant 1 : i32
    %48 = arith.select %47, %c1_i32, %c8_i32 : i32
    %49 = vector.broadcast %48 : i32 to vector<16x128xi32>
    %50 = arith.remsi %46, %49 : vector<16x128xi32>
    %c0_i32_27 = arith.constant 0 : i32
    %51 = vector.broadcast %c0_i32_27 : i32 to vector<16x128xi32>
    %52 = arith.cmpi ne, %50, %51 : vector<16x128xi32>
    %c0_i32_28 = arith.constant 0 : i32
    %53 = vector.broadcast %c0_i32_28 : i32 to vector<16x128xi32>
    %54 = arith.cmpi slt, %50, %53 : vector<16x128xi32>
    %c0_i32_29 = arith.constant 0 : i32
    %55 = arith.cmpi slt, %48, %c0_i32_29 : i32
    %56 = vector.broadcast %55 : i1 to vector<16x128xi1>
    %57 = vector.broadcast %56 : vector<16x128xi1> to vector<16x128xi1>
    %58 = arith.xori %54, %57 : vector<16x128xi1>
    %59 = arith.andi %58, %52 : vector<16x128xi1>
    %60 = vector.broadcast %48 : i32 to vector<16x128xi32>
    %61 = arith.addi %50, %60 : vector<16x128xi32>
    %62 = arith.select %59, %61, %50 : vector<16x128xi1>, vector<16x128xi32>
    %cst_30 = arith.constant 0.000000e+00 : f32
    %63 = vector.broadcast %cst_30 : f32 to vector<16x128xf32>
    %64 = vector.extract_strided_slice %45 {offsets = [0, 7], sizes = [16, 121], strides = [1, 1]} : vector<16x128xf32> to vector<16x121xf32>
    %65 = vector.extract_strided_slice %45 {offsets = [0, 0], sizes = [16, 7], strides = [1, 1]} : vector<16x128xf32> to vector<16x7xf32>
    %66 = tpu.concatenate %64, %65 in 1 : vector<16x121xf32>, vector<16x7xf32> -> vector<16x128xf32>
    %c0_i32_31 = arith.constant 0 : i32
    %67 = vector.broadcast %c0_i32_31 : i32 to vector<16x128xi32>
    %68 = arith.cmpi eq, %62, %67 : vector<16x128xi32>
    %69 = arith.select %68, %66, %63 : vector<16x128xi1>, vector<16x128xf32>
    %70 = vector.extract_strided_slice %45 {offsets = [0, 6], sizes = [16, 122], strides = [1, 1]} : vector<16x128xf32> to vector<16x122xf32>
    %71 = vector.extract_strided_slice %45 {offsets = [0, 0], sizes = [16, 6], strides = [1, 1]} : vector<16x128xf32> to vector<16x6xf32>
    %72 = tpu.concatenate %70, %71 in 1 : vector<16x122xf32>, vector<16x6xf32> -> vector<16x128xf32>
    %c1_i32_32 = arith.constant 1 : i32
    %73 = vector.broadcast %c1_i32_32 : i32 to vector<16x128xi32>
    %74 = arith.cmpi eq, %62, %73 : vector<16x128xi32>
    %75 = arith.select %74, %72, %69 : vector<16x128xi1>, vector<16x128xf32>
    %76 = vector.extract_strided_slice %45 {offsets = [0, 5], sizes = [16, 123], strides = [1, 1]} : vector<16x128xf32> to vector<16x123xf32>
    %77 = vector.extract_strided_slice %45 {offsets = [0, 0], sizes = [16, 5], strides = [1, 1]} : vector<16x128xf32> to vector<16x5xf32>
    %78 = tpu.concatenate %76, %77 in 1 : vector<16x123xf32>, vector<16x5xf32> -> vector<16x128xf32>
    %c2_i32 = arith.constant 2 : i32
    %79 = vector.broadcast %c2_i32 : i32 to vector<16x128xi32>
    %80 = arith.cmpi eq, %62, %79 : vector<16x128xi32>
    %81 = arith.select %80, %78, %75 : vector<16x128xi1>, vector<16x128xf32>
    %82 = vector.extract_strided_slice %45 {offsets = [0, 4], sizes = [16, 124], strides = [1, 1]} : vector<16x128xf32> to vector<16x124xf32>
    %83 = vector.extract_strided_slice %45 {offsets = [0, 0], sizes = [16, 4], strides = [1, 1]} : vector<16x128xf32> to vector<16x4xf32>
    %84 = tpu.concatenate %82, %83 in 1 : vector<16x124xf32>, vector<16x4xf32> -> vector<16x128xf32>
    %c3_i32 = arith.constant 3 : i32
    %85 = vector.broadcast %c3_i32 : i32 to vector<16x128xi32>
    %86 = arith.cmpi eq, %62, %85 : vector<16x128xi32>
    %87 = arith.select %86, %84, %81 : vector<16x128xi1>, vector<16x128xf32>
    %88 = vector.extract_strided_slice %45 {offsets = [0, 3], sizes = [16, 125], strides = [1, 1]} : vector<16x128xf32> to vector<16x125xf32>
    %89 = vector.extract_strided_slice %45 {offsets = [0, 0], sizes = [16, 3], strides = [1, 1]} : vector<16x128xf32> to vector<16x3xf32>
    %90 = tpu.concatenate %88, %89 in 1 : vector<16x125xf32>, vector<16x3xf32> -> vector<16x128xf32>
    %c4_i32 = arith.constant 4 : i32
    %91 = vector.broadcast %c4_i32 : i32 to vector<16x128xi32>
    %92 = arith.cmpi eq, %62, %91 : vector<16x128xi32>
    %93 = arith.select %92, %90, %87 : vector<16x128xi1>, vector<16x128xf32>
    %94 = vector.extract_strided_slice %45 {offsets = [0, 2], sizes = [16, 126], strides = [1, 1]} : vector<16x128xf32> to vector<16x126xf32>
    %95 = vector.extract_strided_slice %45 {offsets = [0, 0], sizes = [16, 2], strides = [1, 1]} : vector<16x128xf32> to vector<16x2xf32>
    %96 = tpu.concatenate %94, %95 in 1 : vector<16x126xf32>, vector<16x2xf32> -> vector<16x128xf32>
    %c5_i32 = arith.constant 5 : i32
    %97 = vector.broadcast %c5_i32 : i32 to vector<16x128xi32>
    %98 = arith.cmpi eq, %62, %97 : vector<16x128xi32>
    %99 = arith.select %98, %96, %93 : vector<16x128xi1>, vector<16x128xf32>
    %100 = vector.extract_strided_slice %45 {offsets = [0, 1], sizes = [16, 127], strides = [1, 1]} : vector<16x128xf32> to vector<16x127xf32>
    %101 = vector.extract_strided_slice %45 {offsets = [0, 0], sizes = [16, 1], strides = [1, 1]} : vector<16x128xf32> to vector<16x1xf32>
    %102 = tpu.concatenate %100, %101 in 1 : vector<16x127xf32>, vector<16x1xf32> -> vector<16x128xf32>
    %c6_i32 = arith.constant 6 : i32
    %103 = vector.broadcast %c6_i32 : i32 to vector<16x128xi32>
    %104 = arith.cmpi eq, %62, %103 : vector<16x128xi32>
    %105 = arith.select %104, %102, %99 : vector<16x128xi1>, vector<16x128xf32>
    %c7_i32 = arith.constant 7 : i32
    %106 = vector.broadcast %c7_i32 : i32 to vector<16x128xi32>
    %107 = arith.cmpi eq, %62, %106 : vector<16x128xi32>
    %108 = arith.select %107, %45, %105 : vector<16x128xi1>, vector<16x128xf32>
    %109 = arith.addf %42, %108 : vector<16x128xf32>
    %c0_33 = arith.constant 0 : index
    %c0_34 = arith.constant 0 : index
    %110 = vector.load %arg6[%c0_33, %c0_34] : memref<16x128xf32, #tpu.memory_space<vmem>>, vector<16x128xf32>
    %111 = arith.addf %109, %110 : vector<16x128xf32>
    %cst_35 = arith.constant dense<0xFF800000> : vector<16xf32>
    %112 = vector.multi_reduction <maximumf>, %111, %cst_35 [1] : vector<16x128xf32> to vector<16xf32>
    %113 = vector.shape_cast %112 : vector<16xf32> to vector<16x1xf32>
    %114 = vector.broadcast %113 : vector<16x1xf32> to vector<16x128xf32>
    %115 = arith.subf %111, %114 : vector<16x128xf32>
    %116 = math.exp %115 : vector<16x128xf32>
    %cst_36 = arith.constant dense<0.000000e+00> : vector<16xf32>
    %117 = vector.multi_reduction <add>, %116, %cst_36 [1] : vector<16x128xf32> to vector<16xf32>
    %118 = vector.shape_cast %117 : vector<16xf32> to vector<16x1xf32>
    %119 = tpu.reciprocal %118 {approx = true} : vector<16x1xf32> -> vector<16x1xf32>
    %120 = vector.broadcast %119 : vector<16x1xf32> to vector<16x128xf32>
    %121 = arith.mulf %116, %120 : vector<16x128xf32>
    %122 = arith.truncf %121 : vector<16x128xf32> to vector<16x128xbf16>
    %123 = arith.truncf %16 : vector<128x32xf32> to vector<128x32xbf16>
    %cst_37 = arith.constant dense<0.000000e+00> : vector<16x32xf32>
    %124 = tpu.matmul %122, %123, %cst_37 {dimension_numbers = #tpu.dot_dimension_numbers<[1], [0], [0], [1], [0, 0, 1, 1], [], []>} : vector<16x128xbf16>, vector<128x32xbf16>, vector<16x32xf32> -> vector<16x32xf32>
    %125 = vector.extract_strided_slice %124 {offsets = [0, 0], sizes = [8, 32], strides = [1, 1]} : vector<16x32xf32> to vector<8x32xf32>
    %126 = vector.extract_strided_slice %25 {offsets = [0, 0], sizes = [1, 32], strides = [1, 1]} : vector<2x32xf32> to vector<1x32xf32>
    %127 = vector.broadcast %126 : vector<1x32xf32> to vector<8x32xf32>
    %128 = arith.mulf %125, %127 : vector<8x32xf32>
    %129 = vector.extract_strided_slice %124 {offsets = [8, 0], sizes = [8, 32], strides = [1, 1]} : vector<16x32xf32> to vector<8x32xf32>
    %130 = vector.extract_strided_slice %25 {offsets = [1, 0], sizes = [1, 32], strides = [1, 1]} : vector<2x32xf32> to vector<1x32xf32>
    %131 = vector.broadcast %130 : vector<1x32xf32> to vector<8x32xf32>
    %132 = arith.mulf %129, %131 : vector<8x32xf32>
    %133 = arith.addf %128, %132 : vector<8x32xf32>
    %134 = arith.truncf %133 : vector<8x32xf32> to vector<8x32xbf16>
    %c0_38 = arith.constant 0 : index
    %c0_39 = arith.constant 0 : index
    %135 = vector.load %arg12[%c0_38, %c0_39] : memref<32x32xbf16, #tpu.memory_space<vmem>>, vector<32x32xbf16>
    %cst_40 = arith.constant dense<0.000000e+00> : vector<8x32xf32>
    %136 = tpu.matmul %134, %135, %cst_40 {dimension_numbers = #tpu.dot_dimension_numbers<[1], [0], [0], [1], [0, 0, 1, 1], [], []>} : vector<8x32xbf16>, vector<32x32xbf16>, vector<8x32xf32> -> vector<8x32xf32>
    %c0_41 = arith.constant 0 : index
    %c0_42 = arith.constant 0 : index
    %137 = vector.load %arg13[%c0_41, %c0_42] : memref<1x32xf32, #tpu.memory_space<vmem>>, vector<1x32xf32>
    %138 = vector.broadcast %137 : vector<1x32xf32> to vector<8x32xf32>
    %139 = arith.addf %136, %138 : vector<8x32xf32>
    %140 = arith.addf %139, %1 : vector<8x32xf32>
    %cst_43 = arith.constant dense<0.000000e+00> : vector<8xf32>
    %141 = vector.multi_reduction <add>, %140, %cst_43 [1] : vector<8x32xf32> to vector<8xf32>
    %142 = vector.shape_cast %141 : vector<8xf32> to vector<8x1xf32>
    %cst_44 = arith.constant 3.200000e+01 : f32
    %143 = vector.broadcast %cst_44 : f32 to vector<8x1xf32>
    %144 = arith.divf %142, %143 : vector<8x1xf32>
    %145 = vector.broadcast %144 : vector<8x1xf32> to vector<8x32xf32>
    %146 = arith.subf %140, %145 : vector<8x32xf32>
    %147 = arith.mulf %146, %146 : vector<8x32xf32>
    %cst_45 = arith.constant dense<0.000000e+00> : vector<8xf32>
    %148 = vector.multi_reduction <add>, %147, %cst_45 [1] : vector<8x32xf32> to vector<8xf32>
    %149 = vector.shape_cast %148 : vector<8xf32> to vector<8x1xf32>
    %cst_46 = arith.constant 3.200000e+01 : f32
    %150 = vector.broadcast %cst_46 : f32 to vector<8x1xf32>
    %151 = arith.divf %149, %150 : vector<8x1xf32>
    %152 = vector.broadcast %144 : vector<8x1xf32> to vector<8x32xf32>
    %153 = arith.subf %140, %152 : vector<8x32xf32>
    %cst_47 = arith.constant 9.99999974E-6 : f32
    %154 = vector.broadcast %cst_47 : f32 to vector<8x1xf32>
    %155 = arith.addf %151, %154 : vector<8x1xf32>
    %156 = math.rsqrt %155 : vector<8x1xf32>
    %157 = vector.broadcast %156 : vector<8x1xf32> to vector<8x32xf32>
    %158 = arith.mulf %153, %157 : vector<8x32xf32>
    %159 = arith.truncf %158 : vector<8x32xf32> to vector<8x32xbf16>
    %c0_48 = arith.constant 0 : index
    %c0_49 = arith.constant 0 : index
    %160 = vector.load %arg14[%c0_48, %c0_49] : memref<32x64xbf16, #tpu.memory_space<vmem>>, vector<32x64xbf16>
    %cst_50 = arith.constant dense<0.000000e+00> : vector<8x64xf32>
    %161 = tpu.matmul %159, %160, %cst_50 {dimension_numbers = #tpu.dot_dimension_numbers<[1], [0], [0], [1], [0, 0, 1, 1], [], []>} : vector<8x32xbf16>, vector<32x64xbf16>, vector<8x64xf32> -> vector<8x64xf32>
    %c0_51 = arith.constant 0 : index
    %c0_52 = arith.constant 0 : index
    %162 = vector.load %arg15[%c0_51, %c0_52] : memref<1x64xf32, #tpu.memory_space<vmem>>, vector<1x64xf32>
    %163 = vector.broadcast %162 : vector<1x64xf32> to vector<8x64xf32>
    %164 = arith.addf %161, %163 : vector<8x64xf32>
    %cst_53 = arith.constant 0.000000e+00 : f32
    %165 = vector.broadcast %cst_53 : f32 to vector<8x64xf32>
    %166 = arith.maximumf %164, %165 : vector<8x64xf32>
    %167 = arith.truncf %166 : vector<8x64xf32> to vector<8x64xbf16>
    %c0_54 = arith.constant 0 : index
    %c0_55 = arith.constant 0 : index
    %168 = vector.load %arg16[%c0_54, %c0_55] : memref<64x32xbf16, #tpu.memory_space<vmem>>, vector<64x32xbf16>
    %cst_56 = arith.constant dense<0.000000e+00> : vector<8x32xf32>
    %169 = tpu.matmul %167, %168, %cst_56 {dimension_numbers = #tpu.dot_dimension_numbers<[1], [0], [0], [1], [0, 0, 1, 1], [], []>} : vector<8x64xbf16>, vector<64x32xbf16>, vector<8x32xf32> -> vector<8x32xf32>
    %c0_57 = arith.constant 0 : index
    %c0_58 = arith.constant 0 : index
    %170 = vector.load %arg17[%c0_57, %c0_58] : memref<1x32xf32, #tpu.memory_space<vmem>>, vector<1x32xf32>
    %171 = vector.broadcast %170 : vector<1x32xf32> to vector<8x32xf32>
    %172 = arith.addf %169, %171 : vector<8x32xf32>
    %173 = arith.addf %172, %158 : vector<8x32xf32>
    %cst_59 = arith.constant dense<0.000000e+00> : vector<8xf32>
    %174 = vector.multi_reduction <add>, %173, %cst_59 [1] : vector<8x32xf32> to vector<8xf32>
    %175 = vector.shape_cast %174 : vector<8xf32> to vector<8x1xf32>
    %cst_60 = arith.constant 3.200000e+01 : f32
    %176 = vector.broadcast %cst_60 : f32 to vector<8x1xf32>
    %177 = arith.divf %175, %176 : vector<8x1xf32>
    %178 = vector.broadcast %177 : vector<8x1xf32> to vector<8x32xf32>
    %179 = arith.subf %173, %178 : vector<8x32xf32>
    %180 = arith.mulf %179, %179 : vector<8x32xf32>
    %cst_61 = arith.constant dense<0.000000e+00> : vector<8xf32>
    %181 = vector.multi_reduction <add>, %180, %cst_61 [1] : vector<8x32xf32> to vector<8xf32>
    %182 = vector.shape_cast %181 : vector<8xf32> to vector<8x1xf32>
    %cst_62 = arith.constant 3.200000e+01 : f32
    %183 = vector.broadcast %cst_62 : f32 to vector<8x1xf32>
    %184 = arith.divf %182, %183 : vector<8x1xf32>
    %185 = vector.broadcast %177 : vector<8x1xf32> to vector<8x32xf32>
    %186 = arith.subf %173, %185 : vector<8x32xf32>
    %cst_63 = arith.constant 9.99999974E-6 : f32
    %187 = vector.broadcast %cst_63 : f32 to vector<8x1xf32>
    %188 = arith.addf %184, %187 : vector<8x1xf32>
    %189 = math.rsqrt %188 : vector<8x1xf32>
    %190 = vector.broadcast %189 : vector<8x1xf32> to vector<8x32xf32>
    %191 = arith.mulf %186, %190 : vector<8x32xf32>
    %c0_64 = arith.constant 0 : index
    %c0_65 = arith.constant 0 : index
    %c0_66 = arith.constant 0 : index
    %192 = vector.load %arg18[%c0_64, %c0_65, %c0_66] : memref<1x8x32xf32, #tpu.memory_space<vmem>>, vector<1x8x32xf32>
    %193 = vector.shape_cast %192 : vector<1x8x32xf32> to vector<8x32xf32>
    %194 = vector.shape_cast %191 : vector<8x32xf32> to vector<1x8x32xf32>
    tpu.vector_store %arg18[%c0_64, %c0_65, %c0_66], %194 {strides = array<i32>} : memref<1x8x32xf32, #tpu.memory_space<vmem>>, vector<1x8x32xf32>,
    return
  }
  func.func @transform_0(%arg0: i32) -> (i32, i32, i32) {
    %c0_i32 = arith.constant 0 : i32
    %c0_i32_0 = arith.constant 0 : i32
    %c0_i32_1 = arith.constant 0 : i32
    return %arg0, %c0_i32, %c0_i32_0 : i32, i32, i32
  }
  func.func @transform_1(%arg0: i32) -> (i32, i32, i32) {
    %c0_i32 = arith.constant 0 : i32
    %c0_i32_0 = arith.constant 0 : i32
    %c0_i32_1 = arith.constant 0 : i32
    return %arg0, %c0_i32, %c0_i32_0 : i32, i32, i32
  }
  func.func @transform_2(%arg0: i32) -> (i32, i32, i32) {
    %c0_i32 = arith.constant 0 : i32
    %c0_i32_0 = arith.constant 0 : i32
    %c0_i32_1 = arith.constant 0 : i32
    return %arg0, %c0_i32, %c0_i32_0 : i32, i32, i32
  }
  func.func @transform_3(%arg0: i32) -> (i32, i32, i32) {
    %c0_i32 = arith.constant 0 : i32
    %c0_i32_0 = arith.constant 0 : i32
    %c0_i32_1 = arith.constant 0 : i32
    return %arg0, %c0_i32, %c0_i32_0 : i32, i32, i32
  }
  func.func @transform_4(%arg0: i32) -> (i32, i32) {
    %c0_i32 = arith.constant 0 : i32
    %c0_i32_0 = arith.constant 0 : i32
    %c0_i32_1 = arith.constant 0 : i32
    return %c0_i32, %c0_i32_0 : i32, i32
  }
  func.func @transform_5(%arg0: i32) -> (i32, i32) {
    %c0_i32 = arith.constant 0 : i32
    %c0_i32_0 = arith.constant 0 : i32
    %c0_i32_1 = arith.constant 0 : i32
    return %c0_i32, %c0_i32_0 : i32, i32
  }
  func.func @transform_6(%arg0: i32) -> (i32, i32) {
    %c0_i32 = arith.constant 0 : i32
    %c0_i32_0 = arith.constant 0 : i32
    %c0_i32_1 = arith.constant 0 : i32
    return %c0_i32, %c0_i32_0 : i32, i32
  }
  func.func @transform_7(%arg0: i32) -> (i32, i32) {
    %c0_i32 = arith.constant 0 : i32
    %c0_i32_0 = arith.constant 0 : i32
    %c0_i32_1 = arith.constant 0 : i32
    return %c0_i32, %c0_i32_0 : i32, i32
  }
  func.func @transform_8(%arg0: i32) -> (i32, i32) {
    %c0_i32 = arith.constant 0 : i32
    %c0_i32_0 = arith.constant 0 : i32
    %c0_i32_1 = arith.constant 0 : i32
    return %c0_i32, %c0_i32_0 : i32, i32
  }
  func.func @transform_9(%arg0: i32) -> (i32, i32) {
    %c0_i32 = arith.constant 0 : i32
    %c0_i32_0 = arith.constant 0 : i32
    %c0_i32_1 = arith.constant 0 : i32
    return %c0_i32, %c0_i32_0 : i32, i32
  }
  func.func @transform_10(%arg0: i32) -> (i32, i32) {
    %c0_i32 = arith.constant 0 : i32
    %c0_i32_0 = arith.constant 0 : i32
    %c0_i32_1 = arith.constant 0 : i32
    return %c0_i32, %c0_i32_0 : i32, i32
  }
  func.func @transform_11(%arg0: i32) -> (i32, i32) {
    %c0_i32 = arith.constant 0 : i32
    %c0_i32_0 = arith.constant 0 : i32
    %c0_i32_1 = arith.constant 0 : i32
    return %c0_i32, %c0_i32_0 : i32, i32
  }
  func.func @transform_12(%arg0: i32) -> (i32, i32) {
    %c0_i32 = arith.constant 0 : i32
    %c0_i32_0 = arith.constant 0 : i32
    %c0_i32_1 = arith.constant 0 : i32
    return %c0_i32, %c0_i32_0 : i32, i32
  }
  func.func @transform_13(%arg0: i32) -> (i32, i32) {
    %c0_i32 = arith.constant 0 : i32
    %c0_i32_0 = arith.constant 0 : i32
    %c0_i32_1 = arith.constant 0 : i32
    return %c0_i32, %c0_i32_0 : i32, i32
  }
  func.func @transform_14(%arg0: i32) -> (i32, i32) {
    %c0_i32 = arith.constant 0 : i32
    %c0_i32_0 = arith.constant 0 : i32
    %c0_i32_1 = arith.constant 0 : i32
    return %c0_i32, %c0_i32_0 : i32, i32
  }
  func.func @transform_15(%arg0: i32) -> (i32, i32) {
    %c0_i32 = arith.constant 0 : i32
    %c0_i32_0 = arith.constant 0 : i32
    %c0_i32_1 = arith.constant 0 : i32
    return %c0_i32, %c0_i32_0 : i32, i32
  }
  func.func @transform_16(%arg0: i32) -> (i32, i32) {
    %c0_i32 = arith.constant 0 : i32
    %c0_i32_0 = arith.constant 0 : i32
    %c0_i32_1 = arith.constant 0 : i32
    return %c0_i32, %c0_i32_0 : i32, i32
  }
  func.func @transform_17(%arg0: i32) -> (i32, i32, i32) {
    %c0_i32 = arith.constant 0 : i32
    %c0_i32_0 = arith.constant 0 : i32
    %c0_i32_1 = arith.constant 0 : i32
    return %arg0, %c0_i32, %c0_i32_0 : i32, i32, i32
  }
}

</mosaic_0001>

<bundles_post_ra>
// kernel: tpu_custom_call.1
= control target key start
LH: loop header
LB: loop body
LE: loop exit
PB: predicated region body
PF: predicated region fallthrough
CT: control target
= control target key end

     0   :  { %6 = vsyncpa [#allocation3], 0  ;;  %s111_s0 = inlined_call_operand.hbm [shape: f32[8,128], index: 0, kind: input, shape index: {}]   ;;  %s112_s1 = inlined_call_operand.hbm [shape: f32[8,128], index: 1, kind: output, shape index: {}]  }
   0x1   :  { %7 = vsyncpa [#allocation4], 0  ;;  %s91_s6 = smov [#allocation2]  }
   0x2   :  { %s14_s7 = sshll.u32 %s91_s6, 4  ;;  %s15_s7 = int_to_ptr.vmem [resolvable:$true] %s14_s7 }
   0x3   :  { %s55_s8 = scalar_lea.vmem %s15_s7, 128  ;;  %p60_p1 = scmp.lt.s32.totalorder %s15_s7, %s15_s7 }
   0x4   :  { %p56_p0 = scmp.ne.s32.totalorder %s15_s7, %s55_s8  ;;  %p61_p2 = scmp.lt.s32.totalorder %s55_s8, %s55_s8 }
   0x6   :  { %p62_p3 = por %p61_p2, %p60_p1 }
   0x8   :  { %p63_p4 = pnand %p62_p3, %p56_p0 }
   0xa   :  { %66 = shalt.err (!%p63_p4)
}
   0xb   :  { %17 = dma.hbm_to_vmem [thread:$0]  %s111_s0, 128, %s15_s7, [#allocation3]  }
   0xc   :  { %87 = dma.done.wait [#allocation3], 128  }
   0xd   :  { %88 = vsyncadd [#allocation3], 4294967168  ;;  %v21_v0 = vld [vmem:[#allocation2] sm:$0xff]  ;;  %s92_s11 = smov 256   ;;  %s93_s12 = smov 121  }
   0xe   :  { %23 = vrot.lane.b32.xlu0 %v21_v0, %s92_s11  ;;  %s94_s13 = smov [#allocation5]  }
   0xf   :  { %s34_s14 = sshll.u32 %s94_s13, 4  ;;  %s35_s14 = int_to_ptr.vmem [resolvable:$true] %s34_s14 }
  0x10   :  { %s67_s15 = scalar_lea.vmem %s35_s14, 128  ;;  %p72_p6 = scmp.lt.s32.totalorder %s35_s14, %s35_s14 }
  0x11   :  { %p68_p5 = scmp.ne.s32.totalorder %s35_s14, %s67_s15  ;;  %p73_p7 = scmp.lt.s32.totalorder %s67_s15, %s67_s15 }
  0x13   :  { %p74_p8 = por %p73_p7, %p72_p6 }
  0x15   :  { %p75_p9 = pnand %p74_p8, %p68_p5 }
  0x80   :  { %v24_v1 = vpop.permute.xlu0 %23 }
  0x81   :  { %25 = vrot.lane.b32.xlu0 %v24_v1, %s93_s12 }
  0xf3   :  { %v26_v2 = vpop.permute.xlu0 %25 }
  0xf4   :  { %27 = vst [vmem:[#allocation5] sm:$0xff] %v26_v2 }
  0xf5   :  { %78 = shalt.err (!%p75_p9)
}
  0xf6   :  { %37 = dma.vmem_to_hbm [thread:$0]  %s35_s14, 128, %s112_s1, [#allocation4]  }
  0xf7   :  { %89 = dma.done.wait [#allocation4], 128  }
  0xf8   :  { %90 = vsyncadd [#allocation4], 4294967168 }
  0xf9   :  { %41 = vsyncpa [#allocation3], 1 }
  0xfa   :  { %42 = vsyncpa [#allocation4], 1 }

// kernel: tpu_custom_call.1
= control target key start
LH: loop header
LB: loop body
LE: loop exit
PB: predicated region body
PF: predicated region fallthrough
CT: control target
= control target key end

     0   :  { %s2397_s0 = inlined_call_operand.vmem [shape: f32[2,8,32], index: 0, kind: input, shape index: {}]   ;;  %s2398_s1 = inlined_call_operand.vmem [shape: bf16[2,128,32], index: 1, kind: input, shape index: {}]   ;;  %s2399_s2 = inlined_call_operand.vmem [shape: f32[2,8,32], index: 2, kind: input, shape index: {}]   ;;  %s2400_s3 = inlined_call_operand.vmem [shape: f32[2,128,64], index: 3, kind: input, shape index: {}]   ;;  %s2401_s4 = inlined_call_operand.vmem [shape: bf16[32,128], index: 4, kind: input, shape index: {}]   ;;  %s2402_s5 = inlined_call_operand.vmem [shape: f32[16,128], index: 5, kind: input, shape index: {}]   ;;  %s2403_s6 = inlined_call_operand.vmem [shape: f32[2,32], index: 6, kind: input, shape index: {}]   ;;  %s2404_s7 = inlined_call_operand.vmem [shape: bf16[32,32], index: 7, kind: input, shape index: {}]   ;;  %s2405_s8 = inlined_call_operand.vmem [shape: bf16[32,64], index: 8, kind: input, shape index: {}]   ;;  %s2406_s9 = inlined_call_operand.vmem [shape: f32[1,32], index: 9, kind: input, shape index: {}]   ;;  %s2407_s10 = inlined_call_operand.vmem [shape: f32[1,32], index: 10, kind: input, shape index: {}]   ;;  %s2408_s11 = inlined_call_operand.vmem [shape: bf16[32,32], index: 11, kind: input, shape index: {}]   ;;  %s2409_s12 = inlined_call_operand.vmem [shape: f32[1,32], index: 12, kind: input, shape index: {}]   ;;  %s2410_s13 = inlined_call_operand.vmem [shape: bf16[32,64], index: 13, kind: input, shape index: {}]   ;;  %s2411_s14 = inlined_call_operand.vmem [shape: f32[1,64], index: 14, kind: input, shape index: {}]   ;;  %s2412_s15 = inlined_call_operand.vmem [shape: bf16[64,32], index: 15, kind: input, shape index: {}]   ;;  %s2413_s16 = inlined_call_operand.vmem [shape: f32[1,32], index: 16, kind: input, shape index: {}]   ;;  %s2414_s17 = inlined_call_operand.hbm [shape: f32[2,8,32], index: 17, kind: output, shape index: {}]  }
   0x1   :  { %2420 = sst [smem:[#allocation10_spill]] %s2397_s0 }
   0x2   :  { %2421 = sst [smem:[#allocation11_spill]] %s2398_s1 }
   0x3   :  { %2422 = sst [smem:[#allocation12_spill]] %s2404_s7 }
   0x4   :  { %22 = vsyncpa [#allocation3], 0 }
   0x5   :  { %24 = vsyncpa [#allocation3 + $0x1], 0  ;;  %s2055_s24 = smov 0   ;;  %s2057_s25 = smov 0  }
   0x6   :  { %s2059_s26 = smov 0   ;;  %s2061_s27 = smov 0  }
   0x7 LB: > { %2423 = sst [smem:[#allocation5_spill]] %s1940_s24  ;;  %s2076_s28 = sadd.s32 4294967295, %s1952_s27   ;;  %s1952_s27 = sphi %s2061_s27, %s2435_s27   ;;  %s1948_s26 = sphi %s2059_s26, %s2437_s26   ;;  %s1944_s25 = sphi %s2057_s25, %s2439_s25   ;;  %s1940_s24 = sphi %s2055_s24, %s2438_s24  }
   0x8   : > { %2424 = sst [smem:[#allocation6_spill]] %s1948_s26  ;;  %s1602_s29 = sadd.s32 4294967294, %s1952_s27  }
   0x9   : > { %s2080_s0 = sadd.s32 1, %s1952_s27   ;;  %s414_s30 = sadd.s32 1, %s1948_s26 }
   0xa   : > { %2425 = sst [smem:[#allocation7_spill]] %s2080_s0  ;;  %s411_s18 = ssub.s32 %s1952_s27, %s2080_s0 }
   0xb   : > { %p424_p0 = scmp.ne.s32.totalorder %s1948_s26, %s1944_s25  ;;  %p412_p1 = scmp.eq.s32.totalorder %s411_s18, 0 }
   0xc   : > { %p425_p2 = scmp.eq.s32.totalorder %s2076_s28, 1  ;;  %p430_p3 = scmp.ne.s32.totalorder %s1944_s25, %s1940_s24 }
   0xd   : > { %p431_p4 = scmp.eq.s32.totalorder %s1602_s29, 1  ;;  %p1605_p7 = scmp.ge.s32.totalorder %s1952_s27, 1 }
   0xe   : > { %s2091_s19 = scalar_select %p412_p1, %s1948_s26, %s414_s30  }
   0xf   : > { %p2093_p5 = por %p425_p2, %p424_p0  ;;  %p2097_p6 = por %p431_p4, %p430_p3 }
  0x10   : > { %2426 = sst [smem:[#allocation8_spill]] %s2091_s19  ;;  %p518_p8 = scmp.lt.s32.totalorder %s1952_s27, 3 }
  0x11   : > { %s2428_s20 = scalar_select %p2097_p6, 1, 0 }
  0x12   : > { %p519_p9 = pnand %p1605_p7, %p518_p8 }
  0x13   : > { %2429 = sst [smem:[#allocation9_spill]] %s2428_s20  ;;  %p583_p10 = scmp.lt.s32.totalorder (!%p519_p9), %s2076_s28, 1 }
  0x14   : > { %522 = sbr.rel (%p519_p9) target bundleno = 2310 (0x906), region = 88  ;;  %s2430_s7 = sld [smem:[#allocation12_spill]] (!%p519_p9) }
  0x15   : > { %s2431_s19 = sld [smem:[#allocation10_spill]] (!%p519_p9)  ;;  %s1956_s20 = smov (!%p519_p9), 122  }
  0x16   : > { %s2432_s24 = sld [smem:[#allocation11_spill]] (!%p519_p9)  ;;  %s1957_s22 = smov (!%p519_p9), 121  }
  0x17   : > { %s1959_s18 = smov (!%p519_p9), 124   ;;  %s580_s0 = sand.u32 (!%p519_p9), 1, %s1944_s25  }
  0x19   : > { %v1954_v1 = vmov 0.0   ;;  %v1859_v2 = vld [vmem:[%s2405_s8 + $0x8] sm:$0xff]   ;;  %vm1955_vm0 = vmmov 0   ;;  %v1861_v4 = vld [vmem:[%s2405_s8] sm:$0xff]   ;;  %s2121_s23 = scalar_select %p583_p10, %s2076_s28, 1  ;;  %vm637_vm1 = vcmask 261120   ;;  %v892_v17 = vlaneseq }
  0x1a   : > { %v1858_v0 = vld [vmem:[%s2430_s7 + $0x8] sm:$0xff]   ;;  %1705 = vmatprep.subr.bf16.mxu0 %v1954_v1  ;;  %v1860_v3 = vld [vmem:[%s2430_s7] sm:$0xff]   ;;  %1709 = vmatprep.mubr.msk.bf16.mxu0 %vm1955_vm0, %v1954_v1 }
  0x1b   : > { %1706 = vmatpush3.bf16.msra.mxu0 %v1858_v0  ;;  %1713 = vmatprep.subr.bf16.mxu1 %v1859_v2  ;;  %s1607_s29 = sshll.u32 %s2121_s23, 3  ;;  %s1658_s30 = sshll.u32 %s2121_s23, 6  ;;  %v1870_v15 = vld [vmem:[%s2401_s4 + $0x8] sm:$0xff]   ;;  %v1871_v16 = vld [vmem:[%s2401_s4] sm:$0xff]   ;;  %v2166_v18 = vshrl.u32 %v892_v17, 7 }
  0x1c   : > { %1707 = vmatprep.subr.bf16.mxu0 %v1954_v1  ;;  %1714 = vmatpush3.bf16.msra.mxu1 %v1859_v2  ;;  %s586_s26 = scalar_lea.vmem %s2431_s19, %s1607_s29  ;;  %s591_s21 = scalar_lea.vmem %s2432_s24, %s1658_s30  ;;  %v891_v24 = vld [vmem:[%s2403_s6] sm:$0x3] }
  0x1d   : > { %1715 = vmatprep.subr.bf16.mxu1 %v1861_v4  ;;  %v2134_v5 = vld [vmem:[%s586_s26] sm:$0xff]  ;;  %v1863_v8 = vld [vmem:[%s591_s21 + $0x8] sm:$0xff]   ;;  %v1864_v9 = vld [vmem:[%s591_s21 + $0x10] sm:$0xff]   ;;  %s1659_s19 = sshll.u32 %s2121_s23, 7  ;;  %s595_s30 = scalar_lea.vmem %s2399_s2, %s1607_s29  ;;  %v894_v20 = vsub.s32 0, %v2166_v18  ;;  %v899_v21 = vsub.s32 1, %v2166_v18 }
  0x1e   : > { %v619_v6 = vpack.c.bf16 %v2134_v5, %v2134_v5  ;;  %v1862_v7 = vld [vmem:[%s591_s21] sm:$0xff]   ;;  %v1865_v10 = vld [vmem:[%s591_s21 + $0x18] sm:$0xff]   ;;  %v1867_v12 = vld [vmem:[%s591_s21 + $0x28] sm:$0xff]   ;;  %s2171_s7 = scalar_lea.vmem %s2400_s3, %s1659_s19  ;;  %s1962_s23 = smov 127  }
  0x1f   : > { %1708 = vmatpush3.bf16.msra.mxu0 %v1860_v3  ;;  %1717 = vmatprep.mubr.msk.bf16.mxu1 %vm637_vm1, %v1862_v7  ;;  %v1866_v11 = vld [vmem:[%s591_s21 + $0x20] sm:$0xff]   ;;  %v1868_v13 = vld [vmem:[%s591_s21 + $0x30] sm:$0xff]   ;;  %v1869_v14 = vld [vmem:[%s591_s21 + $0x38] sm:$0xff]   ;;  %v2185_v32 = vrot.slane %v891_v24, %v894_v20  ;;  %v2187_v33 = vrot.slane %v891_v24, %v899_v21  ;;  %s1960_s21 = smov 125   ;;  %s1963_s19 = smov 96  }
  0x20   : > { %1733 = vmatprep.subr.bf16.mxu0 %v1954_v1  ;;  %1716 = vmatpush3.bf16.msra.mxu1 %v1861_v4  ;;  %v624_v19 = vld [vmem:[%s595_s30] sm:$0xff]  ;;  %v687_v22 = vld [vmem:[%s2171_s7 + $0x10] sm:$0xff]  ;;  %v688_v35 = vld [vmem:[%s2171_s7 + $0x18] sm:$0xff]  ;;  %s1958_s30 = smov 123   ;;  %s1964_s29 = smov [#allocation2]  }
  0x21   : > { %1741 = vmatprep.subr.bf16.mxu1 %v1954_v1  ;;  %v685_v27 = vld [vmem:[%s2171_s7] sm:$0xff]  ;;  %v686_v40 = vld [vmem:[%s2171_s7 + $0x8] sm:$0xff]  ;;  %v699_v58 = vld [vmem:[%s2171_s7 + $0x70] sm:$0xff]  ;;  %s1896_s26 = sshll.u32 %s1964_s29, 4  ;;  %s1897_s26 = int_to_ptr.vmem [resolvable:$false] %s1896_s26 }
  0x22   : > { %1710 = vmatmul.mubr.msk.bf16.vlgmr.msra.gmra.mxu0 %vm637_vm1, %v619_v6  ;;  %v1635_v28 = vld [vmem:[%s2407_s10] ss:$0 sm:$0xff]  ;;  %v700_v61 = vld [vmem:[%s2171_s7 + $0x78] sm:$0xff]  ;;  %v698_v2 = vld [vmem:[%s2171_s7 + $0x68] sm:$0xff] }
  0x23   : > { %1718 = vmatmul.mubr.msk.bf16.vlgmr.msra.gmra.mxu1 %vm637_vm1, %v1863_v8  ;;  %1737 = vmatprep.mubr.msk.bf16.mxu0 %vm1955_vm0, %v1954_v1  ;;  %v697_v63 = vld [vmem:[%s2171_s7 + $0x60] sm:$0xff]  ;;  %v691_v24 = vld [vmem:[%s2171_s7 + $0x30] sm:$0xff] }
  0x24   : > { %1721 = vmatprep.mubr.msk.bf16.mxu1 %vm637_vm1, %v1864_v9  ;;  %1734 = vmatpush3.bf16.msra.mxu0 %v1870_v15  ;;  %v693_v17 = vld [vmem:[%s2171_s7 + $0x40] sm:$0xff] }
  0x25   : > { %1735 = vmatprep.subr.bf16.mxu0 %v1954_v1 }
  0x28   : > { %1736 = vmatpush3.bf16.msra.mxu0 %v1871_v16 }
  0x29   : > { %1761 = vmatprep.subr.bf16.mxu0 %v1954_v1 }
  0x2b   : > { %1722 = vmatmul.mubr.msk.bf16.gmra.mxu1 %vm637_vm1, %v1865_v10 }
  0x2c   : > { %1725 = vmatprep.mubr.msk.bf16.mxu1 %vm637_vm1, %v1866_v11  ;;  %v695_v11 = vld [vmem:[%s2171_s7 + $0x50] sm:$0xff] }
  0x33   : > { %1726 = vmatmul.mubr.msk.bf16.gmra.mxu1 %vm637_vm1, %v1867_v12  ;;  %v696_v12 = vld [vmem:[%s2171_s7 + $0x58] sm:$0xff] }
  0x34   : > { %1729 = vmatprep.mubr.msk.bf16.mxu1 %vm637_vm1, %v1868_v13 }
  0x3b   : > { %1730 = vmatmul.mubr.msk.bf16.gmra.mxu1 %vm637_vm1, %v1869_v14 }
  0x3c   : > { %1757 = vmatprep.mubr.msk.bf16.mxu1 %vm1955_vm0, %v1954_v1 }
  0xe2   : > { %v675_v23 = vpop.f32.mrf.mxu0 }
  0xe3   : > { %v676_v25 = vadd.f32 %v675_v23, %v624_v19  ;;  %v1719_v26 = vpop.f32.mrf.mxu1  ;;  %v694_v19 = vld [vmem:[%s2171_s7 + $0x48] sm:$0xff] }
  0xe4   : > { %v820_v29 = vadd.f32 %v1719_v26, %v687_v22  ;;  %v1711_v30 = vpop.f32.mrf.mxu0 }
  0xe5   : > { %v2183_v31 = vmul.f32 0.25, %v676_v25  ;;  %v811_v34 = vpop.f32.mrf.mxu1  ;;  %v692_v25 = vld [vmem:[%s2171_s7 + $0x38] sm:$0xff]  ;;  %v689_v30 = vld [vmem:[%s2171_s7 + $0x20] sm:$0xff] }
  0xe6   : > { %v812_v36 = vadd.f32 %v811_v34, %v685_v27  ;;  %v678_v37 = vpop.f32.mrf.mxu0  ;;  %v690_v34 = vld [vmem:[%s2171_s7 + $0x28] sm:$0xff]  ;;  %s1961_s7 = smov 126  }
  0xe7   : > { %v890_v38 = vadd.f32 %v1635_v28, %v2183_v31  ;;  %v1720_v39 = vpop.f32.mrf.mxu1 }
  0xe8   : > { %v823_v41 = vadd.f32 %v1720_v39, %v688_v35  ;;  %v1712_v42 = vpop.f32.mrf.mxu0 }
  0xe9   : > { %v902_v43 = vmul.f32 %v2185_v32, %v890_v38  ;;  %v903_v44 = vmul.f32 %v2187_v33, %v890_v38  ;;  %v814_v45 = vpop.f32.mrf.mxu1 }
  0xea   : > { %v2194_v46 = vpack.c.bf16 %v823_v41, %v820_v29  ;;  %v815_v47 = vadd.f32 %v814_v45, %v686_v40  ;;  %v1634_v41 = vld [vmem:[%s2406_s9] ss:$0 sm:$0xff] }
  0xeb   : > { %v913_v48 = vpack.c.bf16 %v903_v44, %v902_v43  ;;  %v1723_v49 = vpop.f32.mrf.mxu1  ;;  %v882_v42 = vadd.f32 %v1634_v41, %v2183_v31 }
  0xec   : > { %v2196_v50 = vpack.c.bf16 %v815_v47, %v812_v36  ;;  %v836_v26 = vadd.f32 %v1723_v49, %v691_v24  ;;  %v1084_v40 = vsel %vm637_vm1, %v2194_v46, 0 }
  0xed   : > { %v827_v51 = vpop.f32.mrf.mxu1  ;;  %1738 = vmatmul.mubr.msk.bf16.vlgmr.msra.gmra.mxu0 %vm637_vm1, %v913_v48  ;;  %v896_v44 = vmul.f32 %v2185_v32, %v882_v42  ;;  %v901_v45 = vmul.f32 %v2187_v33, %v882_v42 }
  0xee   : > { %1777 = vmatprep.mubr.msk.bf16.mxu0 %vm1955_vm0, %v1954_v1  ;;  %v828_v36 = vadd.f32 %v827_v51, %v689_v30  ;;  %v1081_v43 = vsel %vm637_vm1, %v2196_v50, 0 }
  0xef   : > { %v1724_v52 = vpop.f32.mrf.mxu1  ;;  %v904_v47 = vpack.c.bf16 %v901_v45, %v896_v44 }
  0xf0   : > { %v839_v27 = vadd.f32 %v1724_v52, %v692_v25 }
  0xf1   : > { %v830_v53 = vpop.f32.mrf.mxu1 }
  0xf2   : > { %v2230_v29 = vpack.c.bf16 %v839_v27, %v836_v26  ;;  %v831_v37 = vadd.f32 %v830_v53, %v690_v34 }
  0xf3   : > { %v1727_v54 = vpop.f32.mrf.mxu1 }
  0xf4   : > { %v852_v13 = vadd.f32 %v1727_v54, %v695_v11  ;;  %v1090_v35 = vsel %vm637_vm1, %v2230_v29, 0  ;;  %v2238_v38 = vpack.c.bf16 %v831_v37, %v828_v36  ;;  %v1145_v36 = vld [vmem:[%s2402_s5] sm:$0xff] }
  0xf5   : > { %v843_v55 = vpop.f32.mrf.mxu1 }
  0xf6   : > { %v844_v20 = vadd.f32 %v843_v55, %v693_v17  ;;  %v1087_v39 = vsel %vm637_vm1, %v2238_v38, 0 }
  0xf7   : > { %v1728_v56 = vpop.f32.mrf.mxu1 }
  0xf8   : > { %v855_v14 = vadd.f32 %v1728_v56, %v696_v12 }
  0xf9   : > { %v846_v57 = vpop.f32.mrf.mxu1 }
  0xfa   : > { %v2216_v16 = vpack.c.bf16 %v855_v14, %v852_v13  ;;  %v847_v21 = vadd.f32 %v846_v57, %v694_v19 }
  0xfb   : > { %v1731_v59 = vpop.f32.mrf.mxu1 }
  0xfc   : > { %v868_v62 = vadd.f32 %v1731_v59, %v699_v58  ;;  %v1096_v22 = vsel %vm637_vm1, %v2216_v16, 0  ;;  %v2223_v23 = vpack.c.bf16 %v847_v21, %v844_v20 }
  0xfd   : > { %v859_v60 = vpop.f32.mrf.mxu1 }
  0xfe   : > { %v860_v6 = vadd.f32 %v859_v60, %v697_v63  ;;  %v1093_v28 = vsel %vm637_vm1, %v2223_v23, 0  ;;  %v976_v60 = vadd.s32 8, %v2166_v18  ;;  %v981_v63 = vand.u32 7, %v2166_v18 }
  0xff   : > { %v1732_v0 = vpop.f32.mrf.mxu1 }
 0x100   : > { %v871_v3 = vadd.f32 %v1732_v0, %v700_v61  ;;  %v988_v0 = vand.u32 7, %v976_v60  ;;  %vm1009_vm2 = vcmp.eq.s32.totalorder %v981_v63, 0  ;;  %vm1019_vm6 = vcmp.eq.s32.totalorder %v981_v63, 1 }
 0x101   : > { %v862_v4 = vpop.f32.mrf.mxu1  ;;  %vm1029_vm8 = vcmp.eq.s32.totalorder %v981_v63, 2  ;;  %vm1039_vm10 = vcmp.eq.s32.totalorder %v981_v63, 3  ;;  %vm1049_vm11 = vcmp.eq.s32.totalorder %v981_v63, 4  ;;  %vm1059_vm13 = vcmp.eq.s32.totalorder %v981_v63, 5 }
 0x102   : > { %v2205_v7 = vpack.c.bf16 %v871_v3, %v868_v62  ;;  %v863_v8 = vadd.f32 %v862_v4, %v698_v2  ;;  %vm1010_vm3 = vcmp.eq.s32.totalorder %v988_v0, 0  ;;  %vm1020_vm4 = vcmp.eq.s32.totalorder %v988_v0, 1 }
 0x103   : > { %vm1030_vm5 = vcmp.eq.s32.totalorder %v988_v0, 2  ;;  %vm1040_vm7 = vcmp.eq.s32.totalorder %v988_v0, 3  ;;  %vm1050_vm9 = vcmp.eq.s32.totalorder %v988_v0, 4  ;;  %vm1060_vm12 = vcmp.eq.s32.totalorder %v988_v0, 5 }
 0x104   : > { %v1102_v9 = vsel %vm637_vm1, %v2205_v7, 0  ;;  %v2209_v10 = vpack.c.bf16 %v863_v8, %v860_v6  ;;  %vm1070_vm14 = vcmp.eq.s32.totalorder %v988_v0, 6  ;;  %vm1069_vm15 = vcmp.eq.s32.totalorder %v981_v63, 6 }
 0x105   : > { %1742 = vmatpush3.bf16.xpose.msra.mxu1 %v1102_v9 }
 0x106   : > { %1743 = vmatprep.subr.bf16.mxu1 %v1954_v1  ;;  %v1099_v15 = vsel %vm637_vm1, %v2209_v10, 0 }
 0x10d   : > { %1744 = vmatpush3.bf16.xpose.msra.mxu1 %v1099_v15 }
 0x10e   : > { %1745 = vmatprep.subr.bf16.mxu1 %v1954_v1 }
 0x115   : > { %1746 = vmatpush3.bf16.xpose.msra.mxu1 %v1096_v22 }
 0x116   : > { %1747 = vmatprep.subr.bf16.mxu1 %v1954_v1 }
 0x11d   : > { %1748 = vmatpush3.bf16.xpose.msra.mxu1 %v1093_v28 }
 0x11e   : > { %1749 = vmatprep.subr.bf16.mxu1 %v1954_v1 }
 0x125   : > { %1750 = vmatpush3.bf16.xpose.msra.mxu1 %v1090_v35  ;;  %v1146_v35 = vld [vmem:[%s2402_s5 + $0x8] sm:$0xff] }
 0x126   : > { %1751 = vmatprep.subr.bf16.mxu1 %v1954_v1 }
 0x12d   : > { %1752 = vmatpush3.bf16.xpose.msra.mxu1 %v1087_v39 }
 0x12e   : > { %1753 = vmatprep.subr.bf16.mxu1 %v1954_v1 }
 0x135   : > { %1754 = vmatpush3.bf16.xpose.msra.mxu1 %v1084_v40 }
 0x136   : > { %1755 = vmatprep.subr.bf16.mxu1 %v1954_v1 }
 0x13d   : > { %1756 = vmatpush3.bf16.xpose.msra.mxu1 %v1081_v43 }
 0x144   : > { %1758 = vmatmul.mubr.msk.bf16.vlgmr.msra.gmra.mxu1 %vm637_vm1, %v904_v47 }
 0x1ad   : > { %v2255_v48 = vpop.f32.mrf.mxu0 }
 0x1ae   : > { %1013 = vrot.lane.b32.xlu1 %v2255_v48, %s1956_s20  ;;  %1003 = vrot.lane.b32.xlu0 %v2255_v48, %s1957_s22 }
 0x1af   : > { %v1739_v31 = vpop.f32.mrf.mxu0 }
 0x1b1   : > { %v2259_v49 = vpop.f32.mrf.mxu0 }
 0x1b2   : > { %1023 = vrot.lane.b32.xlu0 %v2255_v48, %s1958_s30  ;;  %1015 = vrot.lane.b32.xlu1 %v2259_v49, %s1956_s20  ;;  %s1655_s20 = sshll.u32 %s2076_s28, 7  ;;  %s1898_s28 = scalar_lea.vmem %s1897_s26, 256 }
 0x1b3   : > { %v1740_v51 = vpop.f32.mrf.mxu0 }
 0x1b6   : > { %1033 = vrot.lane.b32.xlu0 %v2255_v48, %s1959_s18  ;;  %1025 = vrot.lane.b32.xlu1 %v2259_v49, %s1958_s30 }
 0x1ba   : > { %1043 = vrot.lane.b32.xlu0 %v2255_v48, %s1960_s21  ;;  %1035 = vrot.lane.b32.xlu1 %v2259_v49, %s1959_s18 }
 0x1be   : > { %1045 = vrot.lane.b32.xlu1 %v2259_v49, %s1960_s21  ;;  %1005 = vrot.lane.b32.xlu0 %v2259_v49, %s1957_s22 }
 0x1c2   : > { %1055 = vrot.lane.b32.xlu1 %v2259_v49, %s1961_s7  ;;  %1053 = vrot.lane.b32.xlu0 %v2255_v48, %s1961_s7  ;;  %s1505_s7 = scalar_lea.hbm %s2414_s17, %s1655_s20 }
 0x1c6   : > { %1065 = vrot.lane.b32.xlu1 %v2259_v49, %s1962_s23  ;;  %1063 = vrot.lane.b32.xlu0 %v2255_v48, %s1962_s23  ;;  %s1494_s23 = scalar_lea.sflag [#allocation3], %s580_s0 }
 0x204   : > { %v1138_v52 = vpop.f32.mrf.mxu1 }
 0x206   : > { %v1759_v53 = vpop.f32.mrf.mxu1 }
 0x208   : > { %v1141_v54 = vpop.f32.mrf.mxu1 }
 0x20a   : > { %v1760_v55 = vpop.f32.mrf.mxu1 }
 0x220   : > { %v1014_v56 = vpop.permute.xlu1 %1013  ;;  %v1004_v57 = vpop.permute.xlu0 %1003 }
 0x221   : > { %v1011_v8 = vsel %vm1009_vm2, %v1004_v57, 0.0  ;;  %vm1074_vm2 = vcmp.eq.s32.totalorder %v988_v0, 7 }
 0x222   : > { %v1021_v13 = vsel %vm1019_vm6, %v1014_v56, %v1011_v8 }
 0x224   : > { %v1024_v58 = vpop.permute.xlu0 %1023  ;;  %v1016_v59 = vpop.permute.xlu1 %1015 }
 0x225   : > { %v1031_v17 = vsel %vm1029_vm8, %v1024_v58, %v1021_v13 }
 0x228   : > { %v1034_v61 = vpop.permute.xlu0 %1033  ;;  %v1026_v62 = vpop.permute.xlu1 %1025 }
 0x229   : > { %v1041_v20 = vsel %vm1039_vm10, %v1034_v61, %v1031_v17 }
 0x22c   : > { %v1044_v2 = vpop.permute.xlu0 %1043  ;;  %v1036_v3 = vpop.permute.xlu1 %1035 }
 0x22d   : > { %v1051_v21 = vsel %vm1049_vm11, %v1044_v2, %v1041_v20  ;;  %v1874_v20 = vld [vmem:[%s2410_s13 + $0x8] sm:$0xff]  }
 0x230   : > { %v1046_v4 = vpop.permute.xlu1 %1045  ;;  %v1006_v6 = vpop.permute.xlu0 %1005 }
 0x231   : > { %v1012_v9 = vsel %vm1010_vm3, %v1006_v6, 0.0  ;;  %vm1073_vm3 = vcmp.eq.s32.totalorder %v981_v63, 7  ;;  %v1640_v6 = vld [vmem:[%s2409_s12] ss:$0 sm:$0xff] }
 0x232   : > { %v1022_v11 = vsel %vm1020_vm4, %v1016_v59, %v1012_v9  ;;  %v1873_v59 = vld [vmem:[%s2408_s11] sm:$0xff]  }
 0x233   : > { %v1032_v12 = vsel %vm1030_vm5, %v1026_v62, %v1022_v11 }
 0x234   : > { %v1056_v18 = vpop.permute.xlu1 %1055  ;;  %v1042_v14 = vsel %vm1040_vm7, %v1036_v3, %v1032_v12  ;;  %v1054_v15 = vpop.permute.xlu0 %1053 }
 0x235   : > { %v1052_v19 = vsel %vm1050_vm9, %v1046_v4, %v1042_v14  ;;  %v1061_v24 = vsel %vm1059_vm13, %v1054_v15, %v1051_v21 }
 0x236   : > { %v1062_v22 = vsel %vm1060_vm12, %v1056_v18, %v1052_v19 }
 0x238   : > { %v1066_v25 = vpop.permute.xlu1 %1065  ;;  %v1064_v26 = vpop.permute.xlu0 %1063 }
 0x239   : > { %v1072_v27 = vsel %vm1070_vm14, %v1066_v25, %v1062_v22  ;;  %v1071_v28 = vsel %vm1069_vm15, %v1064_v26, %v1061_v24 }
 0x23a   : > { %v1076_v30 = vsel %vm1074_vm2, %v2259_v49, %v1072_v27  ;;  %v1075_v34 = vsel %vm1073_vm3, %v2255_v48, %v1071_v28  ;;  %v1876_v27 = vld [vmem:[%s2412_s15 + $0x18] sm:$0xff]  }
 0x23b   : > { %v1142_v37 = vadd.f32 %v1141_v54, %v1076_v30  ;;  %v1139_v39 = vadd.f32 %v1138_v52, %v1075_v34  ;;  %v1877_v30 = vld [vmem:[%s2412_s15 + $0x10] sm:$0xff]   ;;  %v1878_v34 = vld [vmem:[%s2412_s15 + $0x8] sm:$0xff]  }
 0x23d   : > { %v1148_v40 = vadd.f32 %v1146_v35, %v1142_v37  ;;  %v1147_v41 = vadd.f32 %v1145_v36, %v1139_v39  ;;  %v1879_v35 = vld [vmem:[%s2412_s15] sm:$0xff]  }
 0x23e   : > { %v1644_v36 = vld [vmem:[%s2411_s14] ss:$0 sm:$0xff] }
 0x23f   : > { %1151 = vmax.xlane.f32.xlu1 %v1148_v40  ;;  %1149 = vmax.xlane.f32.xlu0 %v1147_v41 }
 0x250   : > { %1188 = vrot.lane.b32.xlu1 %v2209_v10, %s1963_s19 }
 0x254   : > { %1180 = vrot.lane.b32.xlu1 %v2238_v38, %s1963_s19 }
 0x255   : > { %1190 = vrot.lane.b32.xlu0 %v2205_v7, %s1963_s19 }
 0x259   : > { %1186 = vrot.lane.b32.xlu0 %v2216_v16, %s1963_s19 }
 0x25d   : > { %1184 = vrot.lane.b32.xlu0 %v2223_v23, %s1963_s19 }
 0x261   : > { %1182 = vrot.lane.b32.xlu0 %v2230_v29, %s1963_s19 }
 0x265   : > { %1178 = vrot.lane.b32.xlu0 %v2194_v46, %s1963_s19 }
 0x2c8   : > { %v1152_v42 = vpop.xlane.xlu1 %1151  ;;  %v1150_v10 = vpop.xlane.xlu0 %1149 }
 0x2c9   : > { %v1153_v43 = vsub.f32 %v1147_v41, %v1150_v10  ;;  %v1154_v44 = vsub.f32 %v1148_v40, %v1152_v42 }
 0x2cb   : > { %v1155_v38 = vmul.f32 1.442695, %v1153_v43  ;;  %v1157_v7 = vmul.f32 1.442695, %v1154_v44 }
 0x2cc   : > { %v1191_v45 = vpop.permute.xlu0 %1190  ;;  %v1189_v16 = vpop.permute.xlu1 %1188 }
 0x2cd   : > { %1762 = vmatpush3.bf16.msra.mxu0 %v1191_v45  ;;  %1880 = vpow2.f32 %v1155_v38 }
 0x2ce   : > { %1763 = vmatprep.subr.bf16.mxu0 %v1954_v1  ;;  %1882 = vpow2.f32 %v1157_v7 }
 0x2d0   : > { %v1187_v47 = vpop.permute.xlu0 %1186  ;;  %v1181_v31 = vpop.permute.xlu1 %1180 }
 0x2d1   : > { %1764 = vmatpush3.bf16.msra.mxu0 %v1189_v16 }
 0x2d2   : > { %1765 = vmatprep.subr.bf16.mxu0 %v1954_v1 }
 0x2d4   : > { %v1185_v23 = vpop.permute.xlu0 %1184 }
 0x2d5   : > { %1766 = vmatpush3.bf16.msra.mxu0 %v1187_v47 }
 0x2d6   : > { %1767 = vmatprep.subr.bf16.mxu0 %v1954_v1 }
 0x2d8   : > { %v1183_v29 = vpop.permute.xlu0 %1182 }
 0x2d9   : > { %1768 = vmatpush3.bf16.msra.mxu0 %v1185_v23 }
 0x2da   : > { %1769 = vmatprep.subr.bf16.mxu0 %v1954_v1  ;;  %v1881_v46 = vpop.eup %1880 }
 0x2db   : > { %1159 = vadd.xlane.f32.xlu1 %v1881_v46  ;;  %v1883_v48 = vpop.eup %1882 }
 0x2dc   : > { %v1179_v49 = vpop.permute.xlu0 %1178 }
 0x2dd   : > { %1770 = vmatpush3.bf16.msra.mxu0 %v1183_v29 }
 0x2de   : > { %1771 = vmatprep.subr.bf16.mxu0 %v1954_v1 }
 0x2df   : > { %1161 = vadd.xlane.f32.xlu1 %v1883_v48 }
 0x2e1   : > { %1772 = vmatpush3.bf16.msra.mxu0 %v1181_v31 }
 0x2e2   : > { %1773 = vmatprep.subr.bf16.mxu0 %v1954_v1 }
 0x2e5   : > { %1774 = vmatpush3.bf16.msra.mxu0 %v1179_v49 }
 0x2e6   : > { %1775 = vmatprep.subr.bf16.mxu0 %v1954_v1 }
 0x2f0   : > { %1176 = vrot.lane.b32.xlu1 %v2196_v50, %s1963_s19  ;;  %v1872_v50 = vld [vmem:[%s2408_s11 + $0x8] sm:$0xff]   ;;  %s1606_s19 = sshll.u32 %s580_s0, 3 }
 0x2f1   : > { %s582_s22 = scalar_lea.vmem [#allocation2], %s1606_s19 }
 0x2f2   : > { %s1507_s30 = sshll.u32 %s582_s22, 4  ;;  %s1508_s30 = int_to_ptr.vmem [resolvable:$true] %s1507_s30 }
 0x2f3   : > { %s1892_s24 = scalar_lea.vmem %s1508_s30, 128  ;;  %p1899_p0 = scmp.lt.s32.totalorder %s1508_s30, %s1897_s26 }
 0x2f4   : > { %p1893_p11 = scmp.ne.s32.totalorder %s1508_s30, %s1892_s24  ;;  %p1900_p1 = scmp.lt.s32.totalorder %s1898_s28, %s1892_s24 }
 0x2f6   : > { %p1894_p12 = pnand %p1893_p11, %p2093_p5  ;;  %p1901_p2 = por %p1900_p1, %p1899_p0 }
 0x2f8   : > { %p1895_p13 = pneg %p1894_p12 }
 0x2fa   : > { %p1902_p3 = pnand %p1901_p2, %p1895_p13 }
 0x364   : > { %v1160_v51 = vpop.xlane.xlu1 %1159 }
 0x365   : > { %1884 = vrcp.f32 %v1160_v51 }
 0x368   : > { %v1162_v52 = vpop.xlane.xlu1 %1161 }
 0x369   : > { %1886 = vrcp.f32 %v1162_v52 }
 0x36c   : > { %v1177_v53 = vpop.permute.xlu1 %1176 }
 0x36d   : > { %1776 = vmatpush3.bf16.msra.mxu0 %v1177_v53 }
 0x36e   : > { %1781 = vmatprep.subr.bf16.mxu0 %v1954_v1 }
 0x372   : > { %v1885_v54 = vpop.eup %1884 }
 0x373   : > { %v1165_v56 = vmul.f32 %v1885_v54, %v1881_v46 }
 0x376   : > { %v1887_v55 = vpop.eup %1886 }
 0x377   : > { %v1166_v57 = vmul.f32 %v1887_v55, %v1883_v48 }
 0x379   : > { %v1167_v58 = vpack.c.bf16 %v1166_v57, %v1165_v56 }
 0x37b   : > { %1778 = vmatmul.mubr.bf16.vlgmr.msra.gmra.mxu0 %v1167_v58 }
 0x37c   : > { %1785 = vmatprep.mubr.msk.bf16.mxu0 %vm1955_vm0, %v1954_v1  ;;  %1782 = vmatpush3.bf16.msra.mxu0 %v1872_v50 }
 0x37d   : > { %1783 = vmatprep.subr.bf16.mxu0 %v1954_v1 }
 0x380   : > { %1784 = vmatpush3.bf16.msra.mxu0 %v1873_v59 }
 0x381   : > { %1789 = vmatprep.subr.bf16.mxu0 %v1954_v1 }
 0x43b   : > { %v1234_v60 = vpop.f32.mrf.mxu0 }
 0x43c   : > { %v1241_v63 = vmul.f32 %v1234_v60, %v2185_v32 }
 0x43d   : > { %v1779_v61 = vpop.f32.mrf.mxu0 }
 0x43f   : > { %v1237_v62 = vpop.f32.mrf.mxu0 }
 0x440   : > { %v1242_v0 = vmul.f32 %v1237_v62, %v2187_v33 }
 0x441   : > { %v1780_v2 = vpop.f32.mrf.mxu0 }
 0x442   : > { %v1243_v3 = vadd.f32 %v1242_v0, %v1241_v63 }
 0x444   : > { %v1244_v4 = vpack.c.bf16 %v1243_v3, %v1243_v3 }
 0x446   : > { %1786 = vmatmul.mubr.msk.bf16.vlgmr.msra.gmra.mxu0 %vm637_vm1, %v1244_v4 }
 0x447   : > { %1793 = vmatprep.mubr.msk.bf16.mxu0 %vm1955_vm0, %v1954_v1  ;;  %1790 = vmatpush3.bf16.msra.mxu0 %v1874_v20 }
 0x448   : > { %1791 = vmatprep.subr.bf16.mxu0 %v1954_v1 }
 0x506   : > { %v1305_v8 = vpop.f32.mrf.mxu0 }
 0x507   : > { %v1306_v9 = vadd.f32 %v1640_v6, %v1305_v8 }
 0x508   : > { %v1787_v11 = vpop.f32.mrf.mxu0 }
 0x509   : > { %v1311_v12 = vadd.f32 %v1306_v9, %v2134_v5  ;;  %v1875_v5 = vld [vmem:[%s2410_s13] sm:$0xff]  }
 0x50a   : > { %v1308_v32 = vpop.f32.mrf.mxu0  ;;  %1792 = vmatpush3.bf16.msra.mxu0 %v1875_v5 }
 0x50b   : > { %v1312_v33 = vsel %vm637_vm1, %v1311_v12, 0.0  ;;  %1797 = vmatprep.subr.bf16.mxu0 %v1954_v1 }
 0x50c   : > { %1313 = vadd.xlane.f32.xlu0 %v1312_v33  ;;  %v1788_v13 = vpop.f32.mrf.mxu0 }
 0x595   : > { %v1314_v18 = vpop.xlane.xlu0 %1313 }
 0x596   : > { %v1316_v14 = vmul.f32 0.03125, %v1314_v18 }
 0x598   : > { %v1317_v15 = vsub.f32 %v1311_v12, %v1316_v14 }
 0x59a   : > { %v1318_v17 = vmul.f32 %v1317_v15, %v1317_v15 }
 0x59c   : > { %v1319_v19 = vsel %vm637_vm1, %v1318_v17, 0.0 }
 0x59d   : > { %1320 = vadd.xlane.f32.xlu1 %v1319_v19 }
 0x626   : > { %v1321_v21 = vpop.xlane.xlu1 %1320 }
 0x627   : > { %v1322_v22 = vmul.f32 0.03125, %v1321_v21 }
 0x629   : > { %v1323_v24 = vadd.f32 1e-05, %v1322_v22 }
 0x62b   : > { %1888 = vrsqrt.f32 %v1323_v24 }
 0x638   : > { %v1889_v25 = vpop.eup %1888 }
 0x639   : > { %v1325_v26 = vmul.f32 %v1889_v25, %v1317_v15 }
 0x63b   : > { %v1326_v28 = vpack.c.bf16 %v1325_v26, %v1325_v26 }
 0x63d   : > { %1794 = vmatmul.mubr.msk.bf16.vlgmr.msra.gmra.mxu0 %vm637_vm1, %v1326_v28 }
 0x63e   : > { %1798 = vmatpush3.bf16.msra.mxu0 %v1876_v27  ;;  %1805 = vmatprep.mubr.msk.bf16.mxu0 %vm1955_vm0, %v1954_v1  ;;  %vm1434_vm0 = vcmask 523264  }
 0x63f   : > { %1799 = vmatprep.subr.bf16.mxu0 %v1954_v1 }
 0x642   : > { %1800 = vmatpush3.bf16.msra.mxu0 %v1877_v30 }
 0x643   : > { %1801 = vmatprep.subr.bf16.mxu0 %v1954_v1 }
 0x646   : > { %1802 = vmatpush3.bf16.msra.mxu0 %v1878_v34 }
 0x647   : > { %1803 = vmatprep.subr.bf16.mxu0 %v1954_v1  ;;  %v1648_v1 = vld [vmem:[%s2413_s16] ss:$0 sm:$0xff] }
 0x64a   : > { %1804 = vmatpush3.bf16.msra.mxu0 %v1879_v35 }
 0x6fd   : > { %v1387_v37 = vpop.f32.mrf.mxu0 }
 0x6fe   : > { %v1388_v39 = vadd.f32 %v1644_v36, %v1387_v37 }
 0x6ff   : > { %v1795_v40 = vpop.f32.mrf.mxu0 }
 0x700   : > { %v1393_v41 = vmax.f32 %v1388_v39, 0.0 }
 0x701   : > { %v1390_v42 = vpop.f32.mrf.mxu0 }
 0x702   : > { %v1394_v10 = vpack.c.bf16 %v1393_v41, %v1393_v41 }
 0x703   : > { %v1796_v43 = vpop.f32.mrf.mxu0 }
 0x704   : > { %1806 = vmatmul.mubr.msk.bf16.vlgmr.msra.gmra.mxu0 %vm1434_vm0, %v1394_v10 }
 0x7c4   : > { %v1472_v44 = vpop.f32.mrf.mxu0 }
 0x7c5   : > { %v1473_v38 = vadd.f32 %v1648_v1, %v1472_v44 }
 0x7c6   : > { %v1807_v45 = vpop.f32.mrf.mxu0 }
 0x7c7   : > { %v1478_v7 = vadd.f32 %v1473_v38, %v1325_v26 }
 0x7c8   : > { %v1475_v16 = vpop.f32.mrf.mxu0 }
 0x7c9   : > { %v1479_v47 = vsel %vm637_vm1, %v1478_v7, 0.0 }
 0x7ca   : > { %1480 = vadd.xlane.f32.xlu0 %v1479_v47  ;;  %v1808_v23 = vpop.f32.mrf.mxu0 }
 0x853   : > { %v1481_v46 = vpop.xlane.xlu0 %1480 }
 0x854   : > { %v1482_v29 = vmul.f32 0.03125, %v1481_v46 }
 0x856   : > { %v1483_v48 = vsub.f32 %v1478_v7, %v1482_v29 }
 0x858   : > { %v1484_v31 = vmul.f32 %v1483_v48, %v1483_v48 }
 0x85a   : > { %v1485_v49 = vsel %vm637_vm1, %v1484_v31, 0.0 }
 0x85b   : > { %1486 = vadd.xlane.f32.xlu0 %v1485_v49 }
 0x8e4   : > { %v1487_v51 = vpop.xlane.xlu0 %1486 }
 0x8e5   : > { %v1488_v52 = vmul.f32 0.03125, %v1487_v51 }
 0x8e7   : > { %v1489_v53 = vadd.f32 1e-05, %v1488_v52 }
 0x8e9   : > { %1890 = vrsqrt.f32 %v1489_v53 }
 0x8f6   : > { %v1891_v54 = vpop.eup %1890 }
 0x8f7   : > { %v1491_v55 = vmul.f32 %v1891_v54, %v1483_v48 }
 0x8f9   : > { %1492 = vst.msk [vmem:[%s582_s22] sm:$0xff] %vm637_vm1, %v1491_v55 }
 0x8fa   : > { %1905 = shalt.err (!%p1902_p3)
}
 0x8fb   : > { %s1906_s19 = scalar_lea.hbm %s1505_s7, 128  ;;  %s1910_s22 = scalar_lea.hbm %s2414_s17, 256 }
 0x8fc   : > { %p1907_p4 = scmp.ne.s32.totalorder %s1505_s7, %s1906_s19  ;;  %p1911_p9 = scmp.lt.s32.totalorder %s1505_s7, %s2414_s17 }
 0x8fd   : > { %p1912_p10 = scmp.lt.s32.totalorder %s1910_s22, %s1906_s19 }
 0x8fe   : > { %p1908_p7 = pnand %p1907_p4, %p2093_p5 }
 0x8ff   : > { %p1913_p11 = por %p1912_p10, %p1911_p9 }
 0x900   : > { %p1909_p8 = pneg %p1908_p7 }
 0x902   : > { %p1914_p12 = pnand %p1913_p11, %p1909_p8 }
 0x904   : > { %1917 = shalt.err (!%p1914_p12)
}
 0x905   : > { %1809 = dma.vmem_to_hbm [thread:$0]  (%p2093_p5), %s1508_s30, 128, %s1505_s7, %s1494_s23  }
 0x906 PF: > { %s2433_s24 = sld [smem:[#allocation5_spill]]  ;;  %p1815_p13 = scmp.ge.s32.totalorder %s1952_s27, 2 }
 0x908   : > { %p1812_p0 = pnand %p1815_p13, %p2097_p6 }
 0x90a   : > { %p1813_p1 = pneg %p1812_p0 }
 0x90c   : > { %s1519_s26 = sand.u32 1, %s2433_s24  }
 0x90d   : > { %s1520_s28 = scalar_lea.sflag [#allocation3], %s1519_s26 }
 0x90e   : > { %1935 = dma.done.wait (%p1813_p1), %s1520_s28, 128  }
 0x90f   : > { %1937 = vsyncadd (%p1813_p1), %s1520_s28, 4294967168  ;;  %s2435_s27 = sld [smem:[#allocation7_spill]]  ;;  %s2438_s24 = smov %s1944_s25 }
 0x910   : > { %s2436_s19 = sld [smem:[#allocation6_spill]] }
 0x911   : > { %s2437_s26 = sld [smem:[#allocation8_spill]] }
 0x915   : > { %p27_p2 = scmp.ge.s32.totalorder %s2435_s27, 4  }
 0x916   : > { %s2439_s25 = smov %s2436_s19 }
 0x917   :  { %29 = sbr.rel (!%p27_p2) target bundleno = 7 (0x7), region = 132 }
 0x91c   :  { %1525 = vsyncpa [#allocation3], 1 }
 0x91d   :  { %1527 = vsyncpa [#allocation3 + $0x1], 1 }

</bundles_post_ra>
